<compile_context>
chip_gen: v5e
topology: v5e:2x2
jax: 0.10.0
libtpu: 0.0.40
codegen_flags: <defaults>
</compile_context>

<pallas_src>
import functools

import jax
import jax.numpy as jnp
from jax.experimental import pallas as pl
from jax.experimental.pallas import tpu as pltpu


def _round_up(v, m):
    return (v + m - 1) // m * m


def _conv_silu_bn_stage(src_ref, w_ref, p_ref, mask, shifts, base, P, cnt,
                        eps, mask_out):
    """One PyTorch `Conv` block (3x3 conv + bias -> SiLU -> train BN).

    src_ref : (Cin_pad, PW)   feature map; zeros at every halo position and in
                              the [0, base) / [base+P, PW) margins.
    w_ref   : (9, Cout_pad, Cin_pad)  tap-major conv weights.
    p_ref   : (Cout_pad, 3)   packed [bias, bn_gamma, bn_beta].
    mask    : (1, P) bool     True at interior (non-halo, non-tail) positions.
    mask_out: static bool     re-zero halo after BN (needed only when the
                              output is re-read as a conv input).
    returns : (Cout_pad, P)
    """
    # 3x3 conv = 9 accumulating MXU matmuls over statically shifted lane
    # slices; no im2col buffer is ever materialized.
    y = jnp.dot(w_ref[0], src_ref[:, pl.ds(base + shifts[0], P)],
                preferred_element_type=jnp.float32)
    for k in range(1, 9):
        y = y + jnp.dot(w_ref[k], src_ref[:, pl.ds(base + shifts[k], P)],
                        preferred_element_type=jnp.float32)
    y = y + p_ref[:, 0:1]                                        # conv bias
    y = jnp.where(mask, y, 0.0)      # halo/tail -> 0 (keeps BN stats exact)

    # Numerically-stable SiLU: exp argument is always <= 0 (EUP exp), and the
    # divide is an approx reciprocal on the otherwise-idle EUP slot.
    e = jnp.exp(-jnp.abs(y))
    sig = jnp.where(y >= 0.0, 1.0, e) * pl.reciprocal(1.0 + e, approx=True)
    a = y * sig                                                  # silu(0) == 0

    # Train-mode BatchNorm2d with batch statistics over (N, H, W), biased
    # variance.  Sum and sum-of-squares fused into ONE cross-lane reduction;
    # halo/tail positions contribute exactly 0 to both.
    cout = a.shape[0]
    sums = jnp.sum(jnp.concatenate([a, a * a], axis=0),
                   axis=1, keepdims=True) * (1.0 / cnt)          # (2*Cout, 1)
    mean, msq = sums[:cout], sums[cout:]
    var = jnp.maximum(msq - mean * mean, 0.0)                    # guard < 0
    scale = jax.lax.rsqrt(var + eps) * p_ref[:, 1:2]
    out = (a - mean) * scale + p_ref[:, 2:3]

    if mask_out:
        # Re-zero the halo so the next conv sees correct zero padding.
        out = jnp.where(mask, out, 0.0)
    return out


def _cv1_kernel(x_ref, mask_ref, wcv_ref, pcv_ref, wm_ref, pm_ref,
                o_ref, feat_ref, *, N, H, W, base, eps, sh):
    """Fused CV1 forward.

    x_ref    : (c1_pad, PW)   zero-padded, flattened, lane-offset input.
    mask_ref : (1, Ppad)      1.0 at interior spatial positions, 0.0 elsewhere.
    wcv/pcv  : merged c & v block (out channels stacked -> concat is free).
    wm/pm    : m block.
    o_ref    : (c2_pad, Ppad) flattened, lane-padded output.
    feat_ref : (mid_pad, PW)  VMEM scratch holding the concatenated c/v output.
    """
    Hp, Wp = H + 2, W + 2
    Ppad = o_ref.shape[1]                   # lane-padded, multiple of 128
    PW = feat_ref.shape[1]
    cnt = float(N * H * W)                  # BN population (interior only)
    shifts = [(kh - 1) * Wp + (kw - 1) for kh in range(3) for kw in range(3)]

    mask = mask_ref[...] > 0.5              # (1, Ppad) bool

    # Stage 1: c(x) and v(x) fused into one conv (stacked out-channels);
    # the result IS the channel concat.
    f1 = _conv_silu_bn_stage(x_ref, wcv_ref, pcv_ref, mask, shifts,
                             base, Ppad, cnt, eps, mask_out=True)

    # Zero only the halo margins the shifted reads actually touch (the body
    # [base, base+Ppad) is fully overwritten by f1, so zeroing it is wasted
    # store traffic).  All three stores are 128-aligned and lane-dense.
    midp = feat_ref.shape[0]
    feat_ref[:, :base] = jnp.zeros((midp, base), jnp.float32)
    tail = PW - base - Ppad
    if tail > 0:
        feat_ref[:, base + Ppad:] = jnp.zeros((midp, tail), jnp.float32)
    feat_ref[:, pl.ds(base, Ppad)] = f1

    # Stage 2: the m block (its output is cropped by the wrapper, so no
    # post-BN halo re-masking is needed).
    out = _conv_silu_bn_stage(feat_ref, wm_ref, pm_ref, mask, shifts,
                              base, Ppad, cnt, eps, mask_out=False)

    if sh:  # static Python bool (c1 == c2): residual add, fused in-kernel
        out = out + x_ref[:, pl.ds(base, Ppad)]

    o_ref[...] = out


@functools.partial(jax.jit, static_argnames=("c2", "sh"))
def cv1_forward(x_nchw, w_cv, p_cv, w_m, p_m, *, c2, sh):
    N, c1, H, W = x_nchw.shape
    c1p = w_cv.shape[2]               # input channels, padded to multiple of 8
    midp = w_cv.shape[1]              # concatenated c/v channels (padded)
    c2p = w_m.shape[1]                # output channels (padded)
    Hp, Wp = H + 2, W + 2
    P = N * Hp * Wp                   # real flattened padded-spatial extent
    Ppad = _round_up(P, 128)          # lane-dense extent -> unmasked stores
    base = 128                        # lane offset (room for -(Wp+1) shifts)
    PW = _round_up(base + Ppad + Wp + 1, 128)   # room for +/-(Wp+1) shifts

    # --- tiny layout plumbing (fused by XLA): NCHW -> (C, PW) at `base`.
    x = x_nchw.astype(jnp.float32)
    x = jnp.pad(x, ((0, 0), (0, c1p - c1), (0, 0), (0, 0)))       # channel pad
    x = jnp.transpose(x, (1, 0, 2, 3))                            # (c1p,N,H,W)
    x = jnp.pad(x, ((0, 0), (0, 0), (1, 1), (1, 1))).reshape(c1p, P)
    x = jnp.pad(x, ((0, 0), (base, PW - base - P)))               # (c1p, PW)

    mask = jnp.pad(jnp.ones((1, N, H, W), jnp.float32),
                   ((0, 0), (0, 0), (1, 1), (1, 1))).reshape(1, P)
    mask = jnp.pad(mask, ((0, 0), (0, Ppad - P)))                 # (1, Ppad)

    kernel = functools.partial(_cv1_kernel, N=N, H=H, W=W,
                               base=base, eps=1e-5, sh=sh)
    vmem = pl.BlockSpec(memory_space=pltpu.MemorySpace.VMEM)
    out_flat = pl.pallas_call(
        kernel,
        out_shape=jax.ShapeDtypeStruct((c2p, Ppad), jnp.float32),
        in_specs=[vmem] * 6,
        out_specs=vmem,
        scratch_shapes=[pltpu.VMEM((midp, PW), jnp.float32)],
    )(x, mask, w_cv, p_cv, w_m, p_m)

    # Crop lane tail + halo + padded channels, back to NCHW.
    out = out_flat[:, :P].reshape(c2p, N, Hp, Wp)[:c2, :, 1:H + 1, 1:W + 1]
    return jnp.transpose(out, (1, 0, 2, 3))


# ----------------------------- parameter setup ------------------------------

def init_conv_params(key, cin, cout):
    """xavier_normal conv weight (OIHW), PyTorch-default uniform bias,
    fresh BatchNorm gamma=1 / beta=0 (training-mode batch stats)."""
    kw_, kb_ = jax.random.split(key)
    fan_in, fan_out = cin * 9, cout * 9
    std = (2.0 / (fan_in + fan_out)) ** 0.5
    w = std * jax.random.normal(kw_, (cout, cin, 3, 3), jnp.float32)
    bound = 1.0 / (fan_in ** 0.5)
    b = jax.random.uniform(kb_, (cout,), jnp.float32, -bound, bound)
    gamma = jnp.ones((cout,), jnp.float32)
    beta = jnp.zeros((cout,), jnp.float32)
    return w, b, gamma, beta


def _pack_conv(w_oihw, b, gamma, beta, cin_pad, cout_pad):
    """OIHW conv weight -> tap-major (9, Cout_pad, Cin_pad) weight stack
    (one small matmul operand per 3x3 tap); bias/gamma/beta -> one packed
    (Cout_pad, 3) operand.  Zero padding of the extra channels keeps the math
    exact."""
    cout, cin, kh, kw = w_oihw.shape
    w = jnp.pad(w_oihw, ((0, cout_pad - cout), (0, cin_pad - cin),
                         (0, 0), (0, 0)))
    w_taps = jnp.transpose(w, (2, 3, 0, 1)).reshape(kh * kw, cout_pad, cin_pad)
    p = jnp.stack([b, gamma, beta], axis=1)                      # (cout, 3)
    p = jnp.pad(p, ((0, cout_pad - cout), (0, 0)))
    return w_taps, p


def init_cv1_params(key, c1, c2, e=0.5, n=1, shortcut=False):
    # TODO(synk): only n == 1 (a single Conv in self.m) is implemented, which
    # matches the module default and the exercised config.
    assert n == 1
    c_ = int(c2 * e)          # reference uses the ORIGINAL c2 here
    if shortcut:
        c2 = c1
    c1p = _round_up(c1, 8)
    midp = _round_up(2 * c_, 8)
    c2p = _round_up(c2, 8)

    k_c, k_v, k_m = jax.random.split(key, 3)
    wc, bc, gc, bec = init_conv_params(k_c, c1, c_)
    wv, bv, gv, bev = init_conv_params(k_v, c1, c_)
    wm, bm, gm, bem = init_conv_params(k_m, 2 * c_, c2)

    # Merge c & v by stacking out-channels: one conv stage == conv + concat.
    w_cv = jnp.concatenate([wc, wv], axis=0)
    b_cv = jnp.concatenate([bc, bv])
    g_cv = jnp.concatenate([gc, gv])
    be_cv = jnp.concatenate([bec, bev])

    w_cv_taps, p_cv = _pack_conv(w_cv, b_cv, g_cv, be_cv, c1p, midp)
    w_m_taps, p_m = _pack_conv(wm, bm, gm, bem, midp, c2p)

    # NOTE: the PyTorch reference sets `self.sh = c1 == c2` AFTER the possible
    # `c2 = c1` overwrite and regardless of the `shortcut` flag; we match it.
    return dict(w_cv=w_cv_taps, p_cv=p_cv, w_m=w_m_taps, p_m=p_m,
                c2=c2, sh=bool(c1 == c2))


if __name__ == "__main__":
    key = jax.random.PRNGKey(0)
    k_x, k_p = jax.random.split(key)

    # CV1(c1=4, c2=8, e=0.5, n=1, shortcut=False): (2,4,16,16) -> (2,8,16,16)
    c1, c2 = 4, 8
    N, H, W = 2, 16, 16
    x = jax.random.normal(k_x, (N, c1, H, W), jnp.float32)

    params = init_cv1_params(k_p, c1, c2, e=0.5, n=1, shortcut=False)

    out = cv1_forward(x, params["w_cv"], params["p_cv"],
                      params["w_m"], params["p_m"],
                      c2=params["c2"], sh=params["sh"])
    out = jax.block_until_ready(out)

    assert out.shape == (N, c2, H, W), out.shape
    assert bool(jnp.all(jnp.isfinite(out)))
    print("KERNEL_OK")
</pallas_src>

<mosaic_0001>
module attributes {stable_mosaic.version = 11 : i64} {
  func.func @_cv1_kernel(%arg0: memref<8x1024xf32, #tpu.memory_space<vmem>>, %arg1: memref<1x768xf32, #tpu.memory_space<vmem>>, %arg2: memref<9x8x8xf32, #tpu.memory_space<vmem>>, %arg3: memref<8x3xf32, #tpu.memory_space<vmem>>, %arg4: memref<9x8x8xf32, #tpu.memory_space<vmem>>, %arg5: memref<8x3xf32, #tpu.memory_space<vmem>>, %arg6: memref<8x768xf32, #tpu.memory_space<vmem>>, %arg7: memref<8x1024xf32, #tpu.memory_space<vmem>>) attributes {dimension_semantics = [], scalar_prefetch = 0 : i64, scratch_operands = 1 : i64, tpu.core_type = #tpu.core_type<tc>} {
    %c0 = arith.constant 0 : index
    %c0_0 = arith.constant 0 : index
    %0 = vector.load %arg1[%c0, %c0_0] : memref<1x768xf32, #tpu.memory_space<vmem>>, vector<1x768xf32>
    %cst = arith.constant 5.000000e-01 : f32
    %1 = vector.broadcast %cst : f32 to vector<1x768xf32>
    %2 = arith.cmpf ogt, %0, %1 : vector<1x768xf32>
    %c0_1 = arith.constant 0 : index
    %c0_2 = arith.constant 0 : index
    %c0_3 = arith.constant 0 : index
    %3 = vector.load %arg2[%c0_1, %c0_2, %c0_3] : memref<9x8x8xf32, #tpu.memory_space<vmem>>, vector<1x8x8xf32>
    %4 = vector.shape_cast %3 : vector<1x8x8xf32> to vector<8x8xf32>
    %c0_4 = arith.constant 0 : index
    %c109 = arith.constant 109 : index
    %5 = vector.load %arg0[%c0_4, %c109] : memref<8x1024xf32, #tpu.memory_space<vmem>>, vector<8x768xf32>
    %cst_5 = arith.constant dense<0.000000e+00> : vector<8x768xf32>
    %6 = tpu.matmul %4, %5, %cst_5 {dimension_numbers = #tpu.dot_dimension_numbers<[1], [0], [0], [1], [0, 0, 1, 1], [], []>} : vector<8x8xf32>, vector<8x768xf32>, vector<8x768xf32> -> vector<8x768xf32>
    %c1 = arith.constant 1 : index
    %c0_6 = arith.constant 0 : index
    %c0_7 = arith.constant 0 : index
    %7 = vector.load %arg2[%c1, %c0_6, %c0_7] : memref<9x8x8xf32, #tpu.memory_space<vmem>>, vector<1x8x8xf32>
    %8 = vector.shape_cast %7 : vector<1x8x8xf32> to vector<8x8xf32>
    %c0_8 = arith.constant 0 : index
    %c110 = arith.constant 110 : index
    %9 = vector.load %arg0[%c0_8, %c110] : memref<8x1024xf32, #tpu.memory_space<vmem>>, vector<8x768xf32>
    %cst_9 = arith.constant dense<0.000000e+00> : vector<8x768xf32>
    %10 = tpu.matmul %8, %9, %cst_9 {dimension_numbers = #tpu.dot_dimension_numbers<[1], [0], [0], [1], [0, 0, 1, 1], [], []>} : vector<8x8xf32>, vector<8x768xf32>, vector<8x768xf32> -> vector<8x768xf32>
    %11 = arith.addf %6, %10 : vector<8x768xf32>
    %c2 = arith.constant 2 : index
    %c0_10 = arith.constant 0 : index
    %c0_11 = arith.constant 0 : index
    %12 = vector.load %arg2[%c2, %c0_10, %c0_11] : memref<9x8x8xf32, #tpu.memory_space<vmem>>, vector<1x8x8xf32>
    %13 = vector.shape_cast %12 : vector<1x8x8xf32> to vector<8x8xf32>
    %c0_12 = arith.constant 0 : index
    %c111 = arith.constant 111 : index
    %14 = vector.load %arg0[%c0_12, %c111] : memref<8x1024xf32, #tpu.memory_space<vmem>>, vector<8x768xf32>
    %cst_13 = arith.constant dense<0.000000e+00> : vector<8x768xf32>
    %15 = tpu.matmul %13, %14, %cst_13 {dimension_numbers = #tpu.dot_dimension_numbers<[1], [0], [0], [1], [0, 0, 1, 1], [], []>} : vector<8x8xf32>, vector<8x768xf32>, vector<8x768xf32> -> vector<8x768xf32>
    %16 = arith.addf %11, %15 : vector<8x768xf32>
    %c3 = arith.constant 3 : index
    %c0_14 = arith.constant 0 : index
    %c0_15 = arith.constant 0 : index
    %17 = vector.load %arg2[%c3, %c0_14, %c0_15] : memref<9x8x8xf32, #tpu.memory_space<vmem>>, vector<1x8x8xf32>
    %18 = vector.shape_cast %17 : vector<1x8x8xf32> to vector<8x8xf32>
    %c0_16 = arith.constant 0 : index
    %c127 = arith.constant 127 : index
    %19 = vector.load %arg0[%c0_16, %c127] : memref<8x1024xf32, #tpu.memory_space<vmem>>, vector<8x768xf32>
    %cst_17 = arith.constant dense<0.000000e+00> : vector<8x768xf32>
    %20 = tpu.matmul %18, %19, %cst_17 {dimension_numbers = #tpu.dot_dimension_numbers<[1], [0], [0], [1], [0, 0, 1, 1], [], []>} : vector<8x8xf32>, vector<8x768xf32>, vector<8x768xf32> -> vector<8x768xf32>
    %21 = arith.addf %16, %20 : vector<8x768xf32>
    %c4 = arith.constant 4 : index
    %c0_18 = arith.constant 0 : index
    %c0_19 = arith.constant 0 : index
    %22 = vector.load %arg2[%c4, %c0_18, %c0_19] : memref<9x8x8xf32, #tpu.memory_space<vmem>>, vector<1x8x8xf32>
    %23 = vector.shape_cast %22 : vector<1x8x8xf32> to vector<8x8xf32>
    %c0_20 = arith.constant 0 : index
    %c128 = arith.constant 128 : index
    %24 = vector.load %arg0[%c0_20, %c128] : memref<8x1024xf32, #tpu.memory_space<vmem>>, vector<8x768xf32>
    %cst_21 = arith.constant dense<0.000000e+00> : vector<8x768xf32>
    %25 = tpu.matmul %23, %24, %cst_21 {dimension_numbers = #tpu.dot_dimension_numbers<[1], [0], [0], [1], [0, 0, 1, 1], [], []>} : vector<8x8xf32>, vector<8x768xf32>, vector<8x768xf32> -> vector<8x768xf32>
    %26 = arith.addf %21, %25 : vector<8x768xf32>
    %c5 = arith.constant 5 : index
    %c0_22 = arith.constant 0 : index
    %c0_23 = arith.constant 0 : index
    %27 = vector.load %arg2[%c5, %c0_22, %c0_23] : memref<9x8x8xf32, #tpu.memory_space<vmem>>, vector<1x8x8xf32>
    %28 = vector.shape_cast %27 : vector<1x8x8xf32> to vector<8x8xf32>
    %c0_24 = arith.constant 0 : index
    %c129 = arith.constant 129 : index
    %29 = vector.load %arg0[%c0_24, %c129] : memref<8x1024xf32, #tpu.memory_space<vmem>>, vector<8x768xf32>
    %cst_25 = arith.constant dense<0.000000e+00> : vector<8x768xf32>
    %30 = tpu.matmul %28, %29, %cst_25 {dimension_numbers = #tpu.dot_dimension_numbers<[1], [0], [0], [1], [0, 0, 1, 1], [], []>} : vector<8x8xf32>, vector<8x768xf32>, vector<8x768xf32> -> vector<8x768xf32>
    %31 = arith.addf %26, %30 : vector<8x768xf32>
    %c6 = arith.constant 6 : index
    %c0_26 = arith.constant 0 : index
    %c0_27 = arith.constant 0 : index
    %32 = vector.load %arg2[%c6, %c0_26, %c0_27] : memref<9x8x8xf32, #tpu.memory_space<vmem>>, vector<1x8x8xf32>
    %33 = vector.shape_cast %32 : vector<1x8x8xf32> to vector<8x8xf32>
    %c0_28 = arith.constant 0 : index
    %c145 = arith.constant 145 : index
    %34 = vector.load %arg0[%c0_28, %c145] : memref<8x1024xf32, #tpu.memory_space<vmem>>, vector<8x768xf32>
    %cst_29 = arith.constant dense<0.000000e+00> : vector<8x768xf32>
    %35 = tpu.matmul %33, %34, %cst_29 {dimension_numbers = #tpu.dot_dimension_numbers<[1], [0], [0], [1], [0, 0, 1, 1], [], []>} : vector<8x8xf32>, vector<8x768xf32>, vector<8x768xf32> -> vector<8x768xf32>
    %36 = arith.addf %31, %35 : vector<8x768xf32>
    %c7 = arith.constant 7 : index
    %c0_30 = arith.constant 0 : index
    %c0_31 = arith.constant 0 : index
    %37 = vector.load %arg2[%c7, %c0_30, %c0_31] : memref<9x8x8xf32, #tpu.memory_space<vmem>>, vector<1x8x8xf32>
    %38 = vector.shape_cast %37 : vector<1x8x8xf32> to vector<8x8xf32>
    %c0_32 = arith.constant 0 : index
    %c146 = arith.constant 146 : index
    %39 = vector.load %arg0[%c0_32, %c146] : memref<8x1024xf32, #tpu.memory_space<vmem>>, vector<8x768xf32>
    %cst_33 = arith.constant dense<0.000000e+00> : vector<8x768xf32>
    %40 = tpu.matmul %38, %39, %cst_33 {dimension_numbers = #tpu.dot_dimension_numbers<[1], [0], [0], [1], [0, 0, 1, 1], [], []>} : vector<8x8xf32>, vector<8x768xf32>, vector<8x768xf32> -> vector<8x768xf32>
    %41 = arith.addf %36, %40 : vector<8x768xf32>
    %c8 = arith.constant 8 : index
    %c0_34 = arith.constant 0 : index
    %c0_35 = arith.constant 0 : index
    %42 = vector.load %arg2[%c8, %c0_34, %c0_35] : memref<9x8x8xf32, #tpu.memory_space<vmem>>, vector<1x8x8xf32>
    %43 = vector.shape_cast %42 : vector<1x8x8xf32> to vector<8x8xf32>
    %c0_36 = arith.constant 0 : index
    %c147 = arith.constant 147 : index
    %44 = vector.load %arg0[%c0_36, %c147] : memref<8x1024xf32, #tpu.memory_space<vmem>>, vector<8x768xf32>
    %cst_37 = arith.constant dense<0.000000e+00> : vector<8x768xf32>
    %45 = tpu.matmul %43, %44, %cst_37 {dimension_numbers = #tpu.dot_dimension_numbers<[1], [0], [0], [1], [0, 0, 1, 1], [], []>} : vector<8x8xf32>, vector<8x768xf32>, vector<8x768xf32> -> vector<8x768xf32>
    %46 = arith.addf %41, %45 : vector<8x768xf32>
    %c0_38 = arith.constant 0 : index
    %c0_39 = arith.constant 0 : index
    %47 = vector.load %arg3[%c0_38, %c0_39] : memref<8x3xf32, #tpu.memory_space<vmem>>, vector<8x1xf32>
    %48 = vector.broadcast %47 : vector<8x1xf32> to vector<8x768xf32>
    %49 = arith.addf %46, %48 : vector<8x768xf32>
    %cst_40 = arith.constant 0.000000e+00 : f32
    %50 = vector.shape_cast %2 : vector<1x768xi1> to vector<1x768xi1>
    %51 = vector.broadcast %50 : vector<1x768xi1> to vector<8x768xi1>
    %52 = vector.broadcast %cst_40 : f32 to vector<8x768xf32>
    %53 = arith.select %51, %49, %52 : vector<8x768xi1>, vector<8x768xf32>
    %54 = math.absf %53 : vector<8x768xf32>
    %cst_41 = arith.constant 0.000000e+00 : f32
    %55 = vector.broadcast %cst_41 : f32 to vector<8x768xf32>
    %56 = arith.subf %55, %54 : vector<8x768xf32>
    %57 = math.exp %56 : vector<8x768xf32>
    %cst_42 = arith.constant 0.000000e+00 : f32
    %58 = vector.broadcast %cst_42 : f32 to vector<8x768xf32>
    %59 = arith.cmpf oge, %53, %58 : vector<8x768xf32>
    %cst_43 = arith.constant 1.000000e+00 : f32
    %60 = vector.broadcast %cst_43 : f32 to vector<8x768xf32>
    %61 = arith.select %59, %60, %57 : vector<8x768xi1>, vector<8x768xf32>
    %cst_44 = arith.constant 1.000000e+00 : f32
    %62 = vector.broadcast %cst_44 : f32 to vector<8x768xf32>
    %63 = arith.addf %62, %57 : vector<8x768xf32>
    %64 = tpu.reciprocal %63 {approx = true} : vector<8x768xf32> -> vector<8x768xf32>
    %65 = arith.mulf %61, %64 : vector<8x768xf32>
    %66 = arith.mulf %53, %65 : vector<8x768xf32>
    %67 = arith.mulf %66, %66 : vector<8x768xf32>
    %68 = tpu.concatenate %66, %67 in 0 : vector<8x768xf32>, vector<8x768xf32> -> vector<16x768xf32>
    %cst_45 = arith.constant dense<0.000000e+00> : vector<16xf32>
    %69 = vector.multi_reduction <add>, %68, %cst_45 [1] : vector<16x768xf32> to vector<16xf32>
    %70 = vector.shape_cast %69 : vector<16xf32> to vector<16x1xf32>
    %cst_46 = arith.constant 0.001953125 : f32
    %71 = vector.broadcast %cst_46 : f32 to vector<16x1xf32>
    %72 = arith.mulf %70, %71 : vector<16x1xf32>
    %73 = vector.extract_strided_slice %72 {offsets = [0, 0], sizes = [8, 1], strides = [1, 1]} : vector<16x1xf32> to vector<8x1xf32>
    %74 = vector.extract_strided_slice %72 {offsets = [8, 0], sizes = [8, 1], strides = [1, 1]} : vector<16x1xf32> to vector<8x1xf32>
    %75 = arith.mulf %73, %73 : vector<8x1xf32>
    %76 = arith.subf %74, %75 : vector<8x1xf32>
    %cst_47 = arith.constant 0.000000e+00 : f32
    %77 = vector.broadcast %cst_47 : f32 to vector<8x1xf32>
    %78 = arith.maximumf %76, %77 : vector<8x1xf32>
    %cst_48 = arith.constant 9.99999974E-6 : f32
    %79 = vector.broadcast %cst_48 : f32 to vector<8x1xf32>
    %80 = arith.addf %78, %79 : vector<8x1xf32>
    %81 = math.rsqrt %80 : vector<8x1xf32>
    %c0_49 = arith.constant 0 : index
    %c1_50 = arith.constant 1 : index
    %82 = vector.load %arg3[%c0_49, %c1_50] : memref<8x3xf32, #tpu.memory_space<vmem>>, vector<8x1xf32>
    %83 = arith.mulf %81, %82 : vector<8x1xf32>
    %84 = vector.broadcast %73 : vector<8x1xf32> to vector<8x768xf32>
    %85 = arith.subf %66, %84 : vector<8x768xf32>
    %86 = vector.broadcast %83 : vector<8x1xf32> to vector<8x768xf32>
    %87 = arith.mulf %85, %86 : vector<8x768xf32>
    %c0_51 = arith.constant 0 : index
    %c2_52 = arith.constant 2 : index
    %88 = vector.load %arg3[%c0_51, %c2_52] : memref<8x3xf32, #tpu.memory_space<vmem>>, vector<8x1xf32>
    %89 = vector.broadcast %88 : vector<8x1xf32> to vector<8x768xf32>
    %90 = arith.addf %87, %89 : vector<8x768xf32>
    %cst_53 = arith.constant 0.000000e+00 : f32
    %91 = vector.shape_cast %2 : vector<1x768xi1> to vector<1x768xi1>
    %92 = vector.broadcast %91 : vector<1x768xi1> to vector<8x768xi1>
    %93 = vector.broadcast %cst_53 : f32 to vector<8x768xf32>
    %94 = arith.select %92, %90, %93 : vector<8x768xi1>, vector<8x768xf32>
    %cst_54 = arith.constant 0.000000e+00 : f32
    %95 = vector.broadcast %cst_54 : f32 to vector<8x128xf32>
    %c0_55 = arith.constant 0 : index
    %c0_56 = arith.constant 0 : index
    %96 = vector.load %arg7[%c0_55, %c0_56] : memref<8x1024xf32, #tpu.memory_space<vmem>>, vector<8x128xf32>
    tpu.vector_store %arg7[%c0_55, %c0_56], %95 {strides = array<i32>} : memref<8x1024xf32, #tpu.memory_space<vmem>>, vector<8x128xf32>,
    %cst_57 = arith.constant 0.000000e+00 : f32
    %97 = vector.broadcast %cst_57 : f32 to vector<8x128xf32>
    %c0_58 = arith.constant 0 : index
    %c896 = arith.constant 896 : index
    %98 = vector.load %arg7[%c0_58, %c896] : memref<8x1024xf32, #tpu.memory_space<vmem>>, vector<8x128xf32>
    tpu.vector_store %arg7[%c0_58, %c896], %97 {strides = array<i32>} : memref<8x1024xf32, #tpu.memory_space<vmem>>, vector<8x128xf32>,
    %c0_59 = arith.constant 0 : index
    %c128_60 = arith.constant 128 : index
    %99 = vector.load %arg7[%c0_59, %c128_60] : memref<8x1024xf32, #tpu.memory_space<vmem>>, vector<8x768xf32>
    tpu.vector_store %arg7[%c0_59, %c128_60], %94 {strides = array<i32>} : memref<8x1024xf32, #tpu.memory_space<vmem>>, vector<8x768xf32>,
    %c0_61 = arith.constant 0 : index
    %c0_62 = arith.constant 0 : index
    %c0_63 = arith.constant 0 : index
    %100 = vector.load %arg4[%c0_61, %c0_62, %c0_63] : memref<9x8x8xf32, #tpu.memory_space<vmem>>, vector<1x8x8xf32>
    %101 = vector.shape_cast %100 : vector<1x8x8xf32> to vector<8x8xf32>
    %c0_64 = arith.constant 0 : index
    %c109_65 = arith.constant 109 : index
    %102 = vector.load %arg7[%c0_64, %c109_65] : memref<8x1024xf32, #tpu.memory_space<vmem>>, vector<8x768xf32>
    %cst_66 = arith.constant dense<0.000000e+00> : vector<8x768xf32>
    %103 = tpu.matmul %101, %102, %cst_66 {dimension_numbers = #tpu.dot_dimension_numbers<[1], [0], [0], [1], [0, 0, 1, 1], [], []>} : vector<8x8xf32>, vector<8x768xf32>, vector<8x768xf32> -> vector<8x768xf32>
    %c1_67 = arith.constant 1 : index
    %c0_68 = arith.constant 0 : index
    %c0_69 = arith.constant 0 : index
    %104 = vector.load %arg4[%c1_67, %c0_68, %c0_69] : memref<9x8x8xf32, #tpu.memory_space<vmem>>, vector<1x8x8xf32>
    %105 = vector.shape_cast %104 : vector<1x8x8xf32> to vector<8x8xf32>
    %c0_70 = arith.constant 0 : index
    %c110_71 = arith.constant 110 : index
    %106 = vector.load %arg7[%c0_70, %c110_71] : memref<8x1024xf32, #tpu.memory_space<vmem>>, vector<8x768xf32>
    %cst_72 = arith.constant dense<0.000000e+00> : vector<8x768xf32>
    %107 = tpu.matmul %105, %106, %cst_72 {dimension_numbers = #tpu.dot_dimension_numbers<[1], [0], [0], [1], [0, 0, 1, 1], [], []>} : vector<8x8xf32>, vector<8x768xf32>, vector<8x768xf32> -> vector<8x768xf32>
    %108 = arith.addf %103, %107 : vector<8x768xf32>
    %c2_73 = arith.constant 2 : index
    %c0_74 = arith.constant 0 : index
    %c0_75 = arith.constant 0 : index
    %109 = vector.load %arg4[%c2_73, %c0_74, %c0_75] : memref<9x8x8xf32, #tpu.memory_space<vmem>>, vector<1x8x8xf32>
    %110 = vector.shape_cast %109 : vector<1x8x8xf32> to vector<8x8xf32>
    %c0_76 = arith.constant 0 : index
    %c111_77 = arith.constant 111 : index
    %111 = vector.load %arg7[%c0_76, %c111_77] : memref<8x1024xf32, #tpu.memory_space<vmem>>, vector<8x768xf32>
    %cst_78 = arith.constant dense<0.000000e+00> : vector<8x768xf32>
    %112 = tpu.matmul %110, %111, %cst_78 {dimension_numbers = #tpu.dot_dimension_numbers<[1], [0], [0], [1], [0, 0, 1, 1], [], []>} : vector<8x8xf32>, vector<8x768xf32>, vector<8x768xf32> -> vector<8x768xf32>
    %113 = arith.addf %108, %112 : vector<8x768xf32>
    %c3_79 = arith.constant 3 : index
    %c0_80 = arith.constant 0 : index
    %c0_81 = arith.constant 0 : index
    %114 = vector.load %arg4[%c3_79, %c0_80, %c0_81] : memref<9x8x8xf32, #tpu.memory_space<vmem>>, vector<1x8x8xf32>
    %115 = vector.shape_cast %114 : vector<1x8x8xf32> to vector<8x8xf32>
    %c0_82 = arith.constant 0 : index
    %c127_83 = arith.constant 127 : index
    %116 = vector.load %arg7[%c0_82, %c127_83] : memref<8x1024xf32, #tpu.memory_space<vmem>>, vector<8x768xf32>
    %cst_84 = arith.constant dense<0.000000e+00> : vector<8x768xf32>
    %117 = tpu.matmul %115, %116, %cst_84 {dimension_numbers = #tpu.dot_dimension_numbers<[1], [0], [0], [1], [0, 0, 1, 1], [], []>} : vector<8x8xf32>, vector<8x768xf32>, vector<8x768xf32> -> vector<8x768xf32>
    %118 = arith.addf %113, %117 : vector<8x768xf32>
    %c4_85 = arith.constant 4 : index
    %c0_86 = arith.constant 0 : index
    %c0_87 = arith.constant 0 : index
    %119 = vector.load %arg4[%c4_85, %c0_86, %c0_87] : memref<9x8x8xf32, #tpu.memory_space<vmem>>, vector<1x8x8xf32>
    %120 = vector.shape_cast %119 : vector<1x8x8xf32> to vector<8x8xf32>
    %c0_88 = arith.constant 0 : index
    %c128_89 = arith.constant 128 : index
    %121 = vector.load %arg7[%c0_88, %c128_89] : memref<8x1024xf32, #tpu.memory_space<vmem>>, vector<8x768xf32>
    %cst_90 = arith.constant dense<0.000000e+00> : vector<8x768xf32>
    %122 = tpu.matmul %120, %121, %cst_90 {dimension_numbers = #tpu.dot_dimension_numbers<[1], [0], [0], [1], [0, 0, 1, 1], [], []>} : vector<8x8xf32>, vector<8x768xf32>, vector<8x768xf32> -> vector<8x768xf32>
    %123 = arith.addf %118, %122 : vector<8x768xf32>
    %c5_91 = arith.constant 5 : index
    %c0_92 = arith.constant 0 : index
    %c0_93 = arith.constant 0 : index
    %124 = vector.load %arg4[%c5_91, %c0_92, %c0_93] : memref<9x8x8xf32, #tpu.memory_space<vmem>>, vector<1x8x8xf32>
    %125 = vector.shape_cast %124 : vector<1x8x8xf32> to vector<8x8xf32>
    %c0_94 = arith.constant 0 : index
    %c129_95 = arith.constant 129 : index
    %126 = vector.load %arg7[%c0_94, %c129_95] : memref<8x1024xf32, #tpu.memory_space<vmem>>, vector<8x768xf32>
    %cst_96 = arith.constant dense<0.000000e+00> : vector<8x768xf32>
    %127 = tpu.matmul %125, %126, %cst_96 {dimension_numbers = #tpu.dot_dimension_numbers<[1], [0], [0], [1], [0, 0, 1, 1], [], []>} : vector<8x8xf32>, vector<8x768xf32>, vector<8x768xf32> -> vector<8x768xf32>
    %128 = arith.addf %123, %127 : vector<8x768xf32>
    %c6_97 = arith.constant 6 : index
    %c0_98 = arith.constant 0 : index
    %c0_99 = arith.constant 0 : index
    %129 = vector.load %arg4[%c6_97, %c0_98, %c0_99] : memref<9x8x8xf32, #tpu.memory_space<vmem>>, vector<1x8x8xf32>
    %130 = vector.shape_cast %129 : vector<1x8x8xf32> to vector<8x8xf32>
    %c0_100 = arith.constant 0 : index
    %c145_101 = arith.constant 145 : index
    %131 = vector.load %arg7[%c0_100, %c145_101] : memref<8x1024xf32, #tpu.memory_space<vmem>>, vector<8x768xf32>
    %cst_102 = arith.constant dense<0.000000e+00> : vector<8x768xf32>
    %132 = tpu.matmul %130, %131, %cst_102 {dimension_numbers = #tpu.dot_dimension_numbers<[1], [0], [0], [1], [0, 0, 1, 1], [], []>} : vector<8x8xf32>, vector<8x768xf32>, vector<8x768xf32> -> vector<8x768xf32>
    %133 = arith.addf %128, %132 : vector<8x768xf32>
    %c7_103 = arith.constant 7 : index
    %c0_104 = arith.constant 0 : index
    %c0_105 = arith.constant 0 : index
    %134 = vector.load %arg4[%c7_103, %c0_104, %c0_105] : memref<9x8x8xf32, #tpu.memory_space<vmem>>, vector<1x8x8xf32>
    %135 = vector.shape_cast %134 : vector<1x8x8xf32> to vector<8x8xf32>
    %c0_106 = arith.constant 0 : index
    %c146_107 = arith.constant 146 : index
    %136 = vector.load %arg7[%c0_106, %c146_107] : memref<8x1024xf32, #tpu.memory_space<vmem>>, vector<8x768xf32>
    %cst_108 = arith.constant dense<0.000000e+00> : vector<8x768xf32>
    %137 = tpu.matmul %135, %136, %cst_108 {dimension_numbers = #tpu.dot_dimension_numbers<[1], [0], [0], [1], [0, 0, 1, 1], [], []>} : vector<8x8xf32>, vector<8x768xf32>, vector<8x768xf32> -> vector<8x768xf32>
    %138 = arith.addf %133, %137 : vector<8x768xf32>
    %c8_109 = arith.constant 8 : index
    %c0_110 = arith.constant 0 : index
    %c0_111 = arith.constant 0 : index
    %139 = vector.load %arg4[%c8_109, %c0_110, %c0_111] : memref<9x8x8xf32, #tpu.memory_space<vmem>>, vector<1x8x8xf32>
    %140 = vector.shape_cast %139 : vector<1x8x8xf32> to vector<8x8xf32>
    %c0_112 = arith.constant 0 : index
    %c147_113 = arith.constant 147 : index
    %141 = vector.load %arg7[%c0_112, %c147_113] : memref<8x1024xf32, #tpu.memory_space<vmem>>, vector<8x768xf32>
    %cst_114 = arith.constant dense<0.000000e+00> : vector<8x768xf32>
    %142 = tpu.matmul %140, %141, %cst_114 {dimension_numbers = #tpu.dot_dimension_numbers<[1], [0], [0], [1], [0, 0, 1, 1], [], []>} : vector<8x8xf32>, vector<8x768xf32>, vector<8x768xf32> -> vector<8x768xf32>
    %143 = arith.addf %138, %142 : vector<8x768xf32>
    %c0_115 = arith.constant 0 : index
    %c0_116 = arith.constant 0 : index
    %144 = vector.load %arg5[%c0_115, %c0_116] : memref<8x3xf32, #tpu.memory_space<vmem>>, vector<8x1xf32>
    %145 = vector.broadcast %144 : vector<8x1xf32> to vector<8x768xf32>
    %146 = arith.addf %143, %145 : vector<8x768xf32>
    %cst_117 = arith.constant 0.000000e+00 : f32
    %147 = vector.shape_cast %2 : vector<1x768xi1> to vector<1x768xi1>
    %148 = vector.broadcast %147 : vector<1x768xi1> to vector<8x768xi1>
    %149 = vector.broadcast %cst_117 : f32 to vector<8x768xf32>
    %150 = arith.select %148, %146, %149 : vector<8x768xi1>, vector<8x768xf32>
    %151 = math.absf %150 : vector<8x768xf32>
    %cst_118 = arith.constant 0.000000e+00 : f32
    %152 = vector.broadcast %cst_118 : f32 to vector<8x768xf32>
    %153 = arith.subf %152, %151 : vector<8x768xf32>
    %154 = math.exp %153 : vector<8x768xf32>
    %cst_119 = arith.constant 0.000000e+00 : f32
    %155 = vector.broadcast %cst_119 : f32 to vector<8x768xf32>
    %156 = arith.cmpf oge, %150, %155 : vector<8x768xf32>
    %cst_120 = arith.constant 1.000000e+00 : f32
    %157 = vector.broadcast %cst_120 : f32 to vector<8x768xf32>
    %158 = arith.select %156, %157, %154 : vector<8x768xi1>, vector<8x768xf32>
    %cst_121 = arith.constant 1.000000e+00 : f32
    %159 = vector.broadcast %cst_121 : f32 to vector<8x768xf32>
    %160 = arith.addf %159, %154 : vector<8x768xf32>
    %161 = tpu.reciprocal %160 {approx = true} : vector<8x768xf32> -> vector<8x768xf32>
    %162 = arith.mulf %158, %161 : vector<8x768xf32>
    %163 = arith.mulf %150, %162 : vector<8x768xf32>
    %164 = arith.mulf %163, %163 : vector<8x768xf32>
    %165 = tpu.concatenate %163, %164 in 0 : vector<8x768xf32>, vector<8x768xf32> -> vector<16x768xf32>
    %cst_122 = arith.constant dense<0.000000e+00> : vector<16xf32>
    %166 = vector.multi_reduction <add>, %165, %cst_122 [1] : vector<16x768xf32> to vector<16xf32>
    %167 = vector.shape_cast %166 : vector<16xf32> to vector<16x1xf32>
    %cst_123 = arith.constant 0.001953125 : f32
    %168 = vector.broadcast %cst_123 : f32 to vector<16x1xf32>
    %169 = arith.mulf %167, %168 : vector<16x1xf32>
    %170 = vector.extract_strided_slice %169 {offsets = [0, 0], sizes = [8, 1], strides = [1, 1]} : vector<16x1xf32> to vector<8x1xf32>
    %171 = vector.extract_strided_slice %169 {offsets = [8, 0], sizes = [8, 1], strides = [1, 1]} : vector<16x1xf32> to vector<8x1xf32>
    %172 = arith.mulf %170, %170 : vector<8x1xf32>
    %173 = arith.subf %171, %172 : vector<8x1xf32>
    %cst_124 = arith.constant 0.000000e+00 : f32
    %174 = vector.broadcast %cst_124 : f32 to vector<8x1xf32>
    %175 = arith.maximumf %173, %174 : vector<8x1xf32>
    %cst_125 = arith.constant 9.99999974E-6 : f32
    %176 = vector.broadcast %cst_125 : f32 to vector<8x1xf32>
    %177 = arith.addf %175, %176 : vector<8x1xf32>
    %178 = math.rsqrt %177 : vector<8x1xf32>
    %c0_126 = arith.constant 0 : index
    %c1_127 = arith.constant 1 : index
    %179 = vector.load %arg5[%c0_126, %c1_127] : memref<8x3xf32, #tpu.memory_space<vmem>>, vector<8x1xf32>
    %180 = arith.mulf %178, %179 : vector<8x1xf32>
    %181 = vector.broadcast %170 : vector<8x1xf32> to vector<8x768xf32>
    %182 = arith.subf %163, %181 : vector<8x768xf32>
    %183 = vector.broadcast %180 : vector<8x1xf32> to vector<8x768xf32>
    %184 = arith.mulf %182, %183 : vector<8x768xf32>
    %c0_128 = arith.constant 0 : index
    %c2_129 = arith.constant 2 : index
    %185 = vector.load %arg5[%c0_128, %c2_129] : memref<8x3xf32, #tpu.memory_space<vmem>>, vector<8x1xf32>
    %186 = vector.broadcast %185 : vector<8x1xf32> to vector<8x768xf32>
    %187 = arith.addf %184, %186 : vector<8x768xf32>
    %c0_130 = arith.constant 0 : index
    %c0_131 = arith.constant 0 : index
    %188 = vector.load %arg6[%c0_130, %c0_131] : memref<8x768xf32, #tpu.memory_space<vmem>>, vector<8x768xf32>
    tpu.vector_store %arg6[%c0_130, %c0_131], %187 {strides = array<i32>} : memref<8x768xf32, #tpu.memory_space<vmem>>, vector<8x768xf32>,
    return
  }
}

</mosaic_0001>

<bundles_post_ra>
// kernel: cv1_forward.1
= control target key start
LH: loop header
LB: loop body
LE: loop exit
PB: predicated region body
PF: predicated region fallthrough
CT: control target
= control target key end

     0   :  { %s3599_s29 = smov 18   ;;  %s3600_s30 = smov 19   ;;  %vm56_vm0 = vcmask 146432   ;;  %vm69_vm1 = vcmask 64512   ;;  %vm207_vm2 = vcmask 154624   ;;  %vm359_vm3 = vcmask 138240   ;;  %s4291_s0 = inlined_call_operand.vmem [shape: f32[8,1024], index: 0, kind: input, shape index: {}]   ;;  %s4292_s2 = inlined_call_operand.vmem [shape: f32[9,8,8], index: 2, kind: input, shape index: {}]   ;;  %s4293_s3 = inlined_call_operand.vmem [shape: f32[8,3], index: 3, kind: input, shape index: {}]   ;;  %s4294_s1 = inlined_call_operand.vmem [shape: f32[1,768], index: 1, kind: input, shape index: {}]   ;;  %s4295_s4 = inlined_call_operand.vmem [shape: f32[9,8,8], index: 4, kind: input, shape index: {}]   ;;  %s4296_s5 = inlined_call_operand.vmem [shape: f32[8,3], index: 5, kind: input, shape index: {}]   ;;  %s4297_s6 = inlined_call_operand.vmem [shape: f32[8,768], index: 6, kind: output, shape index: {}]  }
   0x1   :  { %v3649_v0 = vld [vmem:[%s4291_s0 + $0x20] sm:$0xff]  ;;  %v3654_v1 = vld [vmem:[%s4291_s0 + $0x28] sm:$0xff]  ;;  %v3659_v2 = vld [vmem:[%s4291_s0 + $0x10] sm:$0xff]  ;;  %s3601_s13 = smov 17   ;;  %s3602_s14 = smov 1   ;;  %vm517_vm4 = vcmask 7168  }
   0x2   :  { %v3311_v3 = vpack.i.bf16 %v3654_v1, %v3649_v0  ;;  %v3666_v4 = vld [vmem:[%s4291_s0 + $0x18] sm:$0xff]  ;;  %v3321_v5 = vpack.i.bf16 %v3649_v0, %v3659_v2  ;;  %v26_v7 = vld [vmem:[%s4291_s0] sm:$0xff]  ;;  %v3681_v8 = vld [vmem:[%s4291_s0 + $0x8] sm:$0xff]  ;;  %s3603_s15 = smov 127   ;;  %s3604_s18 = smov 111   ;;  %vm820_vm5 = vcmask 1039360  }
   0x3   :  { %v3301_v6 = vpack.i.bf16 %v3666_v4, %v3659_v2  ;;  %v3316_v9 = vpack.i.bf16 %v3681_v8, %v26_v7  ;;  %v3687_v10 = vld [vmem:[%s4291_s0 + $0x30] sm:$0xff]  ;;  %v3326_v11 = vpack.i.bf16 %v3666_v4, %v3654_v1  ;;  %v3361_v12 = vpack.i.bf16 %v3659_v2, %v3681_v8  ;;  %v798_v15 = vld [vmem:[%s4291_s0 + $0x38] sm:$0xff]  ;;  %s3605_s19 = smov 110   ;;  %s3606_s0 = smov 109   ;;  %v3159_v26 = vld [vmem:[%s4292_s2 + $0x8] sm:$0xff] }
   0x4   :  { %3312 = vrot.lane.b32.xlu1 %v3311_v3, %s3599_s29  ;;  %3322 = vrot.lane.b32.xlu2 %v3321_v5, %s3600_s30  ;;  %v3366_v13 = vpack.i.bf16 %v3654_v1, %v3666_v4  ;;  %v3376_v14 = vpack.i.bf16 %v3649_v0, %v3666_v4  ;;  %v3371_v16 = vpack.i.bf16 %v3649_v0, %v3687_v10  ;;  %v25_v42 = vld [vmem:[%s4292_s2] sm:$0xff]  ;;  %vm4300_vm6 = vcmask 908288  }
   0x5   :  { %3302 = vrot.lane.b32.xlu0 %v3301_v6, %s3599_s29  ;;  %v3386_v17 = vpack.i.bf16 %v3687_v10, %v3654_v1  ;;  %v3416_v18 = vpack.i.bf16 %v798_v15, %v3687_v10  ;;  %vm4299_vm7 = vcmask 900096   ;;  %vm4298_vm8 = vcmask 891904  }
   0xc   :  { %3317 = vrot.lane.b32.xlu1 %v3316_v9, %s3600_s30  ;;  %54 = vrot.lane.b32.xlu2 %v3687_v10, %s3599_s29 }
   0xd   :  { %3307 = vrot.lane.b32.xlu0 %v3316_v9, %s3599_s29 }
  0x14   :  { %205 = vrot.lane.b32.xlu1 %v3687_v10, %s3600_s30  ;;  %3332 = vrot.lane.b32.xlu2 %v3301_v6, %s3601_s13 }
  0x15   :  { %3327 = vrot.lane.b32.xlu0 %v3326_v11, %s3600_s30 }
  0x1c   :  { %3342 = vrot.lane.b32.xlu1 %v3311_v3, %s3601_s13  ;;  %3347 = vrot.lane.b32.xlu2 %v3316_v9, %s3602_s14 }
  0x1d   :  { %3337 = vrot.lane.b32.xlu0 %v3316_v9, %s3601_s13 }
  0x24   :  { %357 = vrot.lane.b32.xlu1 %v3687_v10, %s3601_s13  ;;  %3357 = vrot.lane.b32.xlu2 %v3326_v11, %s3602_s14 }
  0x25   :  { %3352 = vrot.lane.b32.xlu0 %v3321_v5, %s3602_s14 }
  0x2c   :  { %3362 = vrot.lane.b32.xlu1 %v3361_v12, %s3603_s15  ;;  %3367 = vrot.lane.b32.xlu2 %v3366_v13, %s3603_s15 }
  0x2d   :  { %515 = vrot.lane.b32.xlu0 %v3687_v10, %s3602_s14 }
  0x34   :  { %818 = vrot.lane.b32.xlu1 %v798_v15, %s3603_s15  ;;  %3377 = vrot.lane.b32.xlu2 %v3376_v14, %s3604_s18 }
  0x35   :  { %3372 = vrot.lane.b32.xlu0 %v3371_v16, %s3603_s15 }
  0x3c   :  { %3387 = vrot.lane.b32.xlu1 %v3386_v17, %s3604_s18  ;;  %3392 = vrot.lane.b32.xlu2 %v3361_v12, %s3605_s19 }
  0x3d   :  { %3382 = vrot.lane.b32.xlu0 %v3361_v12, %s3604_s18 }
  0x44   :  { %976 = vrot.lane.b32.xlu1 %v798_v15, %s3604_s18  ;;  %3402 = vrot.lane.b32.xlu2 %v3371_v16, %s3605_s19 }
  0x45   :  { %3397 = vrot.lane.b32.xlu0 %v3366_v13, %s3605_s19 }
  0x4c   :  { %3407 = vrot.lane.b32.xlu1 %v3376_v14, %s3606_s0  ;;  %3412 = vrot.lane.b32.xlu2 %v3361_v12, %s3606_s0  ;;  %v3172_v12 = vld [vmem:[%s4292_s2 + $0x10] sm:$0xff] }
  0x4d   :  { %1134 = vrot.lane.b32.xlu0 %v798_v15, %s3605_s19 }
  0x54   :  { %3417 = vrot.lane.b32.xlu1 %v3416_v18, %s3606_s0 }
  0x55   :  { %1288 = vrot.lane.b32.xlu0 %v3654_v1, %s3606_s0 }
  0x5e   :  { %v3323_v19 = vpop.permute.xlu2 %3322 }
  0x5f   :  { %v3324_v30 = vunpack.i.l.bf16 %v3323_v19  ;;  %v3325_v47 = vunpack.i.h.bf16 %v3323_v19 }
  0x66   :  { %v55_v20 = vpop.permute.xlu2 %54 }
  0x6e   :  { %v3746_v29 = vpop.permute.xlu2 %3332 }
  0x6f   :  { %v3335_v51 = vunpack.i.h.bf16 %v3746_v29  ;;  %v3334_v52 = vunpack.i.l.bf16 %v3746_v29 }
  0x71   :  { %v362_v59 = vsel %vm359_vm3, %v3334_v52, %v3335_v51 }
  0x76   :  { %v3313_v21 = vpop.permute.xlu1 %3312  ;;  %v3348_v46 = vpop.permute.xlu2 %3347 }
  0x77   :  { %v3314_v22 = vunpack.i.l.bf16 %v3313_v21  ;;  %v3303_v23 = vpop.permute.xlu0 %3302  ;;  %v3315_v35 = vunpack.i.h.bf16 %v3313_v21  ;;  %v3350_v53 = vunpack.i.h.bf16 %v3348_v46  ;;  %v3349_v54 = vunpack.i.l.bf16 %v3348_v46  ;;  %v3193_v46 = vld [vmem:[%s4292_s2 + $0x28] sm:$0xff] }
  0x78   :  { %v3305_v24 = vunpack.i.h.bf16 %v3303_v23  ;;  %v3304_v25 = vunpack.i.l.bf16 %v3303_v23 }
  0x79   :  { %v61_v43 = vsel %vm56_vm0, %v3314_v22, %v3315_v35  ;;  %v62_v44 = vsel %vm56_vm0, %v3315_v35, %v55_v20  ;;  %v518_v60 = vsel %vm517_vm4, %v3349_v54, %v3350_v53 }
  0x7a   :  { %v59_v27 = vsel %vm56_vm0, %v3304_v25, %v3305_v24  ;;  %v60_v28 = vsel %vm56_vm0, %v3305_v24, %v3314_v22  ;;  %v3179_v24 = vld [vmem:[%s4292_s2 + $0x18] sm:$0xff] }
  0x7b   :  { %128 = vmatpush.msra.mxu2 %v59_v27  ;;  %148 = vmatpush.msra.mxu3 %v60_v28 }
  0x7c   :  { %3162 = vmatmul.msk.f32.vlgmr.msra.gmra.mxu2 %vm69_vm1, %v3159_v26  ;;  %3163 = vmatmul.msk.f32.vlgmr.msra.gmra.mxu3 %vm69_vm1, %v3159_v26 }
  0x7e   :  { %v3318_v31 = vpop.permute.xlu1 %3317  ;;  %v3358_v13 = vpop.permute.xlu2 %3357 }
  0x7f   :  { %v3320_v32 = vunpack.i.h.bf16 %v3318_v31  ;;  %v3319_v33 = vunpack.i.l.bf16 %v3318_v31  ;;  %v3308_v34 = vpop.permute.xlu0 %3307  ;;  %v3359_v16 = vunpack.i.l.bf16 %v3358_v13  ;;  %v3360_v21 = vunpack.i.h.bf16 %v3358_v13 }
  0x80   :  { %v3310_v36 = vunpack.i.h.bf16 %v3308_v34  ;;  %v3309_v37 = vunpack.i.l.bf16 %v3308_v34 }
  0x81   :  { %v208_v38 = vsel %vm207_vm2, %v3319_v33, %v3320_v32  ;;  %v209_v39 = vsel %vm207_vm2, %v3320_v32, %v3324_v30 }
  0x82   :  { %v57_v40 = vsel %vm56_vm0, %v3309_v37, %v3310_v36  ;;  %v58_v41 = vsel %vm56_vm0, %v3310_v36, %v3304_v25  ;;  %238 = vmatpush.msrb.mxu2 %v208_v38  ;;  %258 = vmatpush.msrb.mxu3 %v209_v39  ;;  %v3186_v39 = vld [vmem:[%s4292_s2 + $0x20] sm:$0xff] }
  0x83   :  { %88 = vmatpush.msra.mxu0 %v57_v40  ;;  %108 = vmatpush.msra.mxu1 %v58_v41 }
  0x84   :  { %3160 = vmatmul.msk.f32.vlgmr.msra.gmra.mxu0 %vm69_vm1, %v3159_v26  ;;  %3161 = vmatmul.msk.f32.vlgmr.msra.gmra.mxu1 %vm69_vm1, %v3159_v26 }
  0x85   :  { %168 = vmatpush.msrb.mxu0 %v61_v43  ;;  %188 = vmatpush.msrb.mxu1 %v62_v44 }
  0x86   :  { %3166 = vmatmul.msk.f32.vlgmr.msrb.gmra.mxu2 %vm69_vm1, %v25_v42  ;;  %3167 = vmatmul.msk.f32.vlgmr.msrb.gmra.mxu3 %vm69_vm1, %v25_v42  ;;  %v206_v45 = vpop.permute.xlu1 %205  ;;  %v3368_v27 = vpop.permute.xlu2 %3367 }
  0x87   :  { %v3328_v48 = vpop.permute.xlu0 %3327  ;;  %v3369_v31 = vunpack.i.l.bf16 %v3368_v27 }
  0x88   :  { %v3330_v49 = vunpack.i.h.bf16 %v3328_v48  ;;  %v3329_v50 = vunpack.i.l.bf16 %v3328_v48 }
  0x8a   :  { %v210_v55 = vsel %vm207_vm2, %v3324_v30, %v3330_v49  ;;  %v211_v56 = vsel %vm207_vm2, %v3330_v49, %v3325_v47  ;;  %v212_v57 = vsel %vm207_vm2, %v3325_v47, %v3329_v50  ;;  %v213_v58 = vsel %vm207_vm2, %v3329_v50, %v206_v45 }
  0x8b   :  { %278 = vmatpush.msra.mxu0 %v210_v55  ;;  %298 = vmatpush.msra.mxu1 %v211_v56 }
  0x8c   :  { %318 = vmatpush.msra.mxu2 %v212_v57  ;;  %338 = vmatpush.msra.mxu3 %v213_v58 }
  0x8d   :  { %3164 = vmatmul.msk.f32.vlgmr.msrb.gmra.mxu0 %vm69_vm1, %v3159_v26  ;;  %3165 = vmatmul.msk.f32.vlgmr.msrb.gmra.mxu1 %vm69_vm1, %v3159_v26 }
  0x8e   :  { %3170 = vmatmul.msk.f32.vlgmr.msra.gmra.mxu2 %vm69_vm1, %v25_v42  ;;  %3171 = vmatmul.msk.f32.vlgmr.msra.gmra.mxu3 %vm69_vm1, %v25_v42  ;;  %v3343_v61 = vpop.permute.xlu1 %3342  ;;  %v3378_v38 = vpop.permute.xlu2 %3377 }
  0x8f   :  { %v3344_v62 = vunpack.i.l.bf16 %v3343_v61  ;;  %v3338_v63 = vpop.permute.xlu0 %3337  ;;  %430 = vmatpush.msrb.mxu2 %v362_v59  ;;  %v3345_v3 = vunpack.i.h.bf16 %v3343_v61  ;;  %v3380_v43 = vunpack.i.h.bf16 %v3378_v38  ;;  %v3379_v44 = vunpack.i.l.bf16 %v3378_v38 }
  0x90   :  { %v3340_v5 = vunpack.i.h.bf16 %v3338_v63  ;;  %v3339_v6 = vunpack.i.l.bf16 %v3338_v63 }
  0x91   :  { %548 = vmatpush.msra.mxu2 %v518_v60  ;;  %v363_v7 = vsel %vm359_vm3, %v3335_v51, %v3344_v62  ;;  %v364_v14 = vsel %vm359_vm3, %v3344_v62, %v3345_v3 }
  0x92   :  { %450 = vmatpush.msrb.mxu3 %v363_v7  ;;  %v361_v9 = vsel %vm359_vm3, %v3340_v5, %v3334_v52  ;;  %v360_v11 = vsel %vm359_vm3, %v3339_v6, %v3340_v5  ;;  %v3200_v6 = vld [vmem:[%s4292_s2 + $0x30] sm:$0xff] }
  0x93   :  { %410 = vmatpush.msrb.mxu1 %v361_v9  ;;  %390 = vmatpush.msrb.mxu0 %v360_v11 }
  0x95   :  { %3168 = vmatmul.msk.f32.vlgmr.msra.gmra.mxu0 %vm69_vm1, %v25_v42  ;;  %3169 = vmatmul.msk.f32.vlgmr.msra.gmra.mxu1 %vm69_vm1, %v25_v42 }
  0x96   :  { %3175 = vmatmul.msk.f32.vlgmr.msrb.gmra.mxu2 %vm69_vm1, %v3172_v12  ;;  %3176 = vmatmul.msk.f32.vlgmr.msrb.gmra.mxu3 %vm69_vm1, %v3172_v12  ;;  %v358_v15 = vpop.permute.xlu1 %357  ;;  %v3393_v49 = vpop.permute.xlu2 %3392 }
  0x97   :  { %v3353_v17 = vpop.permute.xlu0 %3352  ;;  %v365_v18 = vsel %vm359_vm3, %v3345_v3, %v358_v15  ;;  %470 = vmatpush.msra.mxu0 %v364_v14  ;;  %v3394_v54 = vunpack.i.l.bf16 %v3393_v49 }
  0x98   :  { %v3355_v19 = vunpack.i.h.bf16 %v3353_v17  ;;  %v3354_v20 = vunpack.i.l.bf16 %v3353_v17  ;;  %490 = vmatpush.msra.mxu1 %v365_v18  ;;  %v3207_v18 = vld [vmem:[%s4292_s2 + $0x38] sm:$0xff] }
  0x9a   :  { %v519_v22 = vsel %vm517_vm4, %v3350_v53, %v3354_v20  ;;  %v522_v23 = vsel %vm517_vm4, %v3355_v19, %v3359_v16  ;;  %v520_v25 = vsel %vm517_vm4, %v3354_v20, %v3360_v21  ;;  %v521_v26 = vsel %vm517_vm4, %v3360_v21, %v3355_v19 }
  0x9b   :  { %568 = vmatpush.msra.mxu3 %v519_v22  ;;  %628 = vmatpush.msrb.mxu2 %v522_v23  ;;  %v3395_v53 = vunpack.i.h.bf16 %v3393_v49 }
  0x9d   :  { %3173 = vmatmul.msk.f32.vlgmr.msrb.gmra.mxu0 %vm69_vm1, %v3172_v12  ;;  %3174 = vmatmul.msk.f32.vlgmr.msrb.gmra.mxu1 %vm69_vm1, %v3172_v12  ;;  %v1137_v58 = vsel %vm4299_vm7, %v3394_v54, %v3395_v53 }
  0x9e   :  { %3180 = vmatmul.msk.f32.vlgmr.msra.gmra.mxu2 %vm69_vm1, %v3179_v24  ;;  %3181 = vmatmul.msk.f32.vlgmr.msra.gmra.mxu3 %vm69_vm1, %v3179_v24  ;;  %v3363_v28 = vpop.permute.xlu1 %3362  ;;  %v3403_v61 = vpop.permute.xlu2 %3402 }
  0x9f   :  { %v516_v29 = vpop.permute.xlu0 %515  ;;  %588 = vmatpush.msrb.mxu0 %v520_v25  ;;  %608 = vmatpush.msrb.mxu1 %v521_v26  ;;  %v3365_v32 = vunpack.i.h.bf16 %v3363_v28  ;;  %v3364_v33 = vunpack.i.l.bf16 %v3363_v28  ;;  %v3404_v5 = vunpack.i.l.bf16 %v3403_v61  ;;  %v3405_v14 = vunpack.i.h.bf16 %v3403_v61 }
  0xa0   :  { %v523_v30 = vsel %vm517_vm4, %v3359_v16, %v516_v29  ;;  %719 = vmatpush.msra.mxu2 %v3666_v4 }
  0xa1   :  { %648 = vmatpush.msrb.mxu3 %v523_v30  ;;  %v821_v34 = vsel %vm820_vm5, %v3364_v33, %v3365_v32  ;;  %v822_v35 = vsel %vm820_vm5, %v3365_v32, %v3369_v31 }
  0xa3   :  { %739 = vmatpush.msra.mxu3 %v3649_v0  ;;  %v3370_v0 = vunpack.i.h.bf16 %v3368_v27 }
  0xa5   :  { %3177 = vmatmul.msk.f32.vlgmr.msra.gmra.mxu0 %vm69_vm1, %v3172_v12  ;;  %3178 = vmatmul.msk.f32.vlgmr.msra.gmra.mxu1 %vm69_vm1, %v3172_v12 }
  0xa6   :  { %3184 = vmatmul.msk.f32.vlgmr.msrb.gmra.mxu2 %vm69_vm1, %v3179_v24  ;;  %3185 = vmatmul.msk.f32.vlgmr.msrb.gmra.mxu3 %vm69_vm1, %v3179_v24  ;;  %v819_v4 = vpop.permute.xlu1 %818  ;;  %v3413_v23 = vpop.permute.xlu2 %3412 }
  0xa7   :  { %679 = vmatpush.msra.mxu0 %v3681_v8  ;;  %699 = vmatpush.msra.mxu1 %v3659_v2  ;;  %v3373_v36 = vpop.permute.xlu0 %3372  ;;  %v3414_v25 = vunpack.i.l.bf16 %v3413_v23 }
  0xa8   :  { %851 = vmatpush.msrb.mxu2 %v821_v34  ;;  %871 = vmatpush.msrb.mxu3 %v822_v35  ;;  %v3374_v37 = vunpack.i.l.bf16 %v3373_v36  ;;  %v3375_v42 = vunpack.i.h.bf16 %v3373_v36  ;;  %v3877_v34 = vld [vmem:[%s4293_s3] sm:$0xff]  ;;  %v3607_v35 = vmov 0  }
  0xa9   :  { %3421 = vset.pattern.permute.xlu2 %v3607_v35  ;;  %3544 = vset.pattern.permute.xlu0 %v3607_v35 }
  0xaa   :  { %v825_v40 = vsel %vm820_vm5, %v3370_v0, %v3374_v37  ;;  %v826_v8 = vsel %vm820_vm5, %v3374_v37, %v819_v4  ;;  %v823_v47 = vsel %vm820_vm5, %v3369_v31, %v3375_v42  ;;  %v824_v48 = vsel %vm820_vm5, %v3375_v42, %v3370_v0  ;;  %v3214_v31 = vld [vmem:[%s4292_s2 + $0x40] sm:$0xff]  ;;  %1439 = vperm.xlu2 %3421, %v3877_v34  }
  0xad   :  { %3182 = vmatmul.msk.f32.vlgmr.msrb.gmra.mxu0 %vm69_vm1, %v3179_v24  ;;  %3183 = vmatmul.msk.f32.vlgmr.msrb.gmra.mxu1 %vm69_vm1, %v3179_v24  ;;  %v3415_v24 = vunpack.i.h.bf16 %v3413_v23 }
  0xae   :  { %3189 = vmatmul.msk.f32.vlgmr.msra.gmra.mxu2 %vm69_vm1, %v3186_v39  ;;  %3190 = vmatmul.msk.f32.vlgmr.msra.gmra.mxu3 %vm69_vm1, %v3186_v39  ;;  %v3388_v2 = vpop.permute.xlu1 %3387 }
  0xaf   :  { %759 = vmatpush.msrb.mxu0 %v3654_v1  ;;  %779 = vmatpush.msrb.mxu1 %v3687_v10  ;;  %v3383_v41 = vpop.permute.xlu0 %3382  ;;  %v3389_v45 = vunpack.i.l.bf16 %v3388_v2  ;;  %v981_v1 = vsel %vm4300_vm6, %v3379_v44, %v3380_v43  ;;  %v3390_v62 = vunpack.i.h.bf16 %v3388_v2  ;;  %v1295_v27 = vsel %vm4298_vm8, %v3414_v25, %v3415_v24 }
  0xb0   :  { %931 = vmatpush.msra.mxu2 %v825_v40  ;;  %951 = vmatpush.msra.mxu3 %v826_v8  ;;  %v3385_v51 = vunpack.i.h.bf16 %v3383_v41  ;;  %v3384_v52 = vunpack.i.l.bf16 %v3383_v41 }
  0xb1   :  { %v982_v10 = vsel %vm4300_vm6, %v3380_v43, %v3389_v45  ;;  %v983_v9 = vsel %vm4300_vm6, %v3389_v45, %v3390_v62 }
  0xb2   :  { %v980_v56 = vsel %vm4300_vm6, %v3385_v51, %v3379_v44  ;;  %v979_v57 = vsel %vm4300_vm6, %v3384_v52, %v3385_v51 }
  0xb5   :  { %3187 = vmatmul.msk.f32.vlgmr.msra.gmra.mxu0 %vm69_vm1, %v3186_v39  ;;  %3188 = vmatmul.msk.f32.vlgmr.msra.gmra.mxu1 %vm69_vm1, %v3186_v39 }
  0xb6   :  { %3194 = vmatmul.msk.f32.vlgmr.msrb.gmra.mxu2 %vm69_vm1, %v3193_v46  ;;  %3195 = vmatmul.msk.f32.vlgmr.msrb.gmra.mxu3 %vm69_vm1, %v3193_v46  ;;  %v977_v60 = vpop.permute.xlu1 %976 }
  0xb7   :  { %891 = vmatpush.msra.mxu0 %v823_v47  ;;  %911 = vmatpush.msra.mxu1 %v824_v48  ;;  %v3398_v50 = vpop.permute.xlu0 %3397  ;;  %v984_v7 = vsel %vm4300_vm6, %v3390_v62, %v977_v60 }
  0xb8   :  { %1049 = vmatpush.msrb.mxu2 %v981_v1  ;;  %1069 = vmatpush.msrb.mxu3 %v982_v10  ;;  %v3399_v55 = vunpack.i.l.bf16 %v3398_v50  ;;  %v3400_v3 = vunpack.i.h.bf16 %v3398_v50 }
  0xba   :  { %v1138_v59 = vsel %vm4299_vm7, %v3395_v53, %v3399_v55  ;;  %v1141_v12 = vsel %vm4299_vm7, %v3400_v3, %v3404_v5  ;;  %v1139_v19 = vsel %vm4299_vm7, %v3399_v55, %v3405_v14  ;;  %v1140_v20 = vsel %vm4299_vm7, %v3405_v14, %v3400_v3 }
  0xbd   :  { %3191 = vmatmul.msk.f32.vlgmr.msrb.gmra.mxu0 %vm69_vm1, %v3186_v39  ;;  %3192 = vmatmul.msk.f32.vlgmr.msrb.gmra.mxu1 %vm69_vm1, %v3186_v39 }
  0xbe   :  { %3198 = vmatmul.msk.f32.vlgmr.msra.gmra.mxu2 %vm69_vm1, %v3193_v46  ;;  %3199 = vmatmul.msk.f32.vlgmr.msra.gmra.mxu3 %vm69_vm1, %v3193_v46  ;;  %v3408_v13 = vpop.permute.xlu1 %3407 }
  0xbf   :  { %1029 = vmatpush.msrb.mxu1 %v980_v56  ;;  %1009 = vmatpush.msrb.mxu0 %v979_v57  ;;  %v1135_v63 = vpop.permute.xlu0 %1134  ;;  %v3410_v15 = vunpack.i.h.bf16 %v3408_v13  ;;  %v3409_v16 = vunpack.i.l.bf16 %v3408_v13 }
  0xc0   :  { %1167 = vmatpush.msra.mxu2 %v1137_v58  ;;  %1187 = vmatpush.msra.mxu3 %v1138_v59  ;;  %v1142_v11 = vsel %vm4299_vm7, %v3404_v5, %v1135_v63 }
  0xc1   :  { %v1297_v22 = vsel %vm4298_vm8, %v3409_v16, %v3410_v15  ;;  %v1296_v26 = vsel %vm4298_vm8, %v3415_v24, %v3409_v16  ;;  %v23_v16 = vld [vmem:[%s4294_s1] sm:$0x3f] }
  0xc2   :  { %vm24_vm9 = vcmp.gt.f32.partialorder %v23_v16, 0.5 }
  0xc5   :  { %3196 = vmatmul.msk.f32.vlgmr.msra.gmra.mxu0 %vm69_vm1, %v3193_v46  ;;  %3197 = vmatmul.msk.f32.vlgmr.msra.gmra.mxu1 %vm69_vm1, %v3193_v46 }
  0xc6   :  { %3203 = vmatmul.msk.f32.vlgmr.msrb.gmra.mxu2 %vm69_vm1, %v3200_v6  ;;  %3204 = vmatmul.msk.f32.vlgmr.msrb.gmra.mxu3 %vm69_vm1, %v3200_v6  ;;  %v3418_v28 = vpop.permute.xlu1 %3417 }
  0xc7   :  { %1089 = vmatpush.msra.mxu0 %v983_v9  ;;  %1109 = vmatpush.msra.mxu1 %v984_v7  ;;  %v1289_v17 = vpop.permute.xlu0 %1288  ;;  %v3420_v29 = vunpack.i.h.bf16 %v3418_v28  ;;  %v3419_v30 = vunpack.i.l.bf16 %v3418_v28 }
  0xc8   :  { %1247 = vmatpush.msrb.mxu2 %v1141_v12  ;;  %1267 = vmatpush.msrb.mxu3 %v1142_v11  ;;  %v1298_v21 = vsel %vm4298_vm8, %v3410_v15, %v1289_v17 }
  0xc9   :  { %v1299_v32 = vsel %vm4298_vm8, %v1289_v17, %v3419_v30  ;;  %v1300_v33 = vsel %vm4298_vm8, %v3419_v30, %v3420_v29 }
  0xcd   :  { %3201 = vmatmul.msk.f32.vlgmr.msrb.gmra.mxu0 %vm69_vm1, %v3200_v6  ;;  %3202 = vmatmul.msk.f32.vlgmr.msrb.gmra.mxu1 %vm69_vm1, %v3200_v6 }
  0xce   :  { %3208 = vmatmul.msk.f32.vlgmr.msra.gmra.mxu2 %vm69_vm1, %v3207_v18  ;;  %3209 = vmatmul.msk.f32.vlgmr.msra.gmra.mxu3 %vm69_vm1, %v3207_v18 }
  0xcf   :  { %1207 = vmatpush.msrb.mxu0 %v1139_v19  ;;  %1227 = vmatpush.msrb.mxu1 %v1140_v20 }
  0xd0   :  { %1365 = vmatpush.msra.mxu2 %v1297_v22  ;;  %1385 = vmatpush.msra.mxu3 %v1298_v21 }
  0xd5   :  { %3205 = vmatmul.msk.f32.vlgmr.msra.gmra.mxu0 %vm69_vm1, %v3200_v6  ;;  %3206 = vmatmul.msk.f32.vlgmr.msra.gmra.mxu1 %vm69_vm1, %v3200_v6 }
  0xd6   :  { %3212 = vmatmul.msk.f32.vlgmr.msrb.gmra.mxu2 %vm69_vm1, %v3207_v18  ;;  %3213 = vmatmul.msk.f32.vlgmr.msrb.gmra.mxu3 %vm69_vm1, %v3207_v18 }
  0xd7   :  { %1345 = vmatpush.msra.mxu1 %v1296_v26  ;;  %1325 = vmatpush.msra.mxu0 %v1295_v27 }
  0xdd   :  { %3210 = vmatmul.msk.f32.vlgmr.msrb.gmra.mxu0 %vm69_vm1, %v3207_v18  ;;  %3211 = vmatmul.msk.f32.vlgmr.msrb.gmra.mxu1 %vm69_vm1, %v3207_v18 }
  0xde   :  { %3217 = vmatmul.msk.f32.vlgmr.msra.gmra.mxu2 %vm69_vm1, %v3214_v31  ;;  %3218 = vmatmul.msk.f32.vlgmr.msra.gmra.mxu3 %vm69_vm1, %v3214_v31 }
  0xdf   :  { %1405 = vmatpush.msrb.mxu0 %v1299_v32  ;;  %1425 = vmatpush.msrb.mxu1 %v1300_v33 }
  0xe5   :  { %3215 = vmatmul.msk.f32.vlgmr.msra.gmra.mxu0 %vm69_vm1, %v3214_v31  ;;  %3216 = vmatmul.msk.f32.vlgmr.msra.gmra.mxu1 %vm69_vm1, %v3214_v31 }
  0xed   :  { %3219 = vmatmul.msk.f32.vlgmr.msrb.gmra.mxu0 %vm69_vm1, %v3214_v31  ;;  %3220 = vmatmul.msk.f32.vlgmr.msrb.gmra.mxu1 %vm69_vm1, %v3214_v31  ;;  %v3902_v31 = vsel %vm24_vm9, 1, %v3607_v35 }
  0xff   :  { %v130_v4 = vpop.f32.mrf.mxu2  ;;  %v150_v36 = vpop.f32.mrf.mxu3 }
 0x101   :  { %v90_v0 = vpop.f32.mrf.mxu0  ;;  %v110_v37 = vpop.f32.mrf.mxu1 }
 0x109   :  { %v240_v38 = vpop.f32.mrf.mxu2  ;;  %v260_v39 = vpop.f32.mrf.mxu3 }
 0x10a   :  { %v170_v40 = vpop.f32.mrf.mxu0  ;;  %v190_v8 = vpop.f32.mrf.mxu1  ;;  %v241_v19 = vadd.f32 %v240_v38, %v90_v0  ;;  %v261_v20 = vadd.f32 %v260_v39, %v110_v37 }
 0x111   :  { %v320_v2 = vpop.f32.mrf.mxu2  ;;  %v340_v41 = vpop.f32.mrf.mxu3 }
 0x112   :  { %v280_v42 = vpop.f32.mrf.mxu0  ;;  %v300_v43 = vpop.f32.mrf.mxu1  ;;  %v321_v0 = vadd.f32 %v320_v2, %v170_v40  ;;  %v341_v37 = vadd.f32 %v340_v41, %v190_v8  ;;  %v1449_v41 = vperm.slane %v3902_v31, 0 }
 0x113   :  { %v281_v17 = vadd.f32 %v280_v42, %v130_v4  ;;  %v301_v18 = vadd.f32 %v300_v43, %v150_v36  ;;  %v1440_v2 = vpop.permute.xlu2 %1439 }
 0x114   :  { %vm3918_vm12 = vcmp.eq.s32.totalorder %v1449_v41, 1 }
 0x119   :  { %v432_v44 = vpop.f32.mrf.mxu2  ;;  %v452_v45 = vpop.f32.mrf.mxu3 }
 0x11a   :  { %v392_v46 = vpop.f32.mrf.mxu0  ;;  %v412_v47 = vpop.f32.mrf.mxu1  ;;  %v497_v21 = vadd.f32 %v432_v44, %v281_v17  ;;  %v498_v22 = vadd.f32 %v452_v45, %v301_v18 }
 0x11b   :  { %v495_v23 = vadd.f32 %v392_v46, %v241_v19  ;;  %v496_v24 = vadd.f32 %v412_v47, %v261_v20 }
 0x121   :  { %v550_v48 = vpop.f32.mrf.mxu2  ;;  %v570_v49 = vpop.f32.mrf.mxu3 }
 0x122   :  { %v472_v1 = vpop.f32.mrf.mxu0  ;;  %v492_v10 = vpop.f32.mrf.mxu1  ;;  %v653_v27 = vadd.f32 %v550_v48, %v495_v23  ;;  %v654_v28 = vadd.f32 %v570_v49, %v496_v24  ;;  %v1451_v48 = vperm.slane %v3902_v31, 2  ;;  %v1452_v49 = vperm.slane %v3902_v31, 3 }
 0x123   :  { %v499_v44 = vadd.f32 %v472_v1, %v321_v0  ;;  %v500_v45 = vadd.f32 %v492_v10, %v341_v37  ;;  %v1450_v1 = vperm.slane %v3902_v31, 1 }
 0x124   :  { %vm3908_vm10 = vcmp.eq.s32.totalorder %v1451_v48, 1  ;;  %vm3912_vm11 = vcmp.eq.s32.totalorder %v1452_v49, 1 }
 0x125   :  { %vm3922_vm13 = vcmp.eq.s32.totalorder %v1450_v1, 1 }
 0x129   :  { %v630_v50 = vpop.f32.mrf.mxu2  ;;  %v650_v51 = vpop.f32.mrf.mxu3 }
 0x12a   :  { %v590_v52 = vpop.f32.mrf.mxu0  ;;  %v610_v53 = vpop.f32.mrf.mxu1 }
 0x12b   :  { %v655_v25 = vadd.f32 %v590_v52, %v497_v21  ;;  %v656_v26 = vadd.f32 %v610_v53, %v498_v22  ;;  %v657_v53 = vadd.f32 %v630_v50, %v499_v44 }
 0x131   :  { %v721_v54 = vpop.f32.mrf.mxu2  ;;  %v741_v55 = vpop.f32.mrf.mxu3 }
 0x132   :  { %v681_v56 = vpop.f32.mrf.mxu0  ;;  %v701_v57 = vpop.f32.mrf.mxu1  ;;  %v786_v32 = vadd.f32 %v721_v54, %v655_v25  ;;  %v787_v33 = vadd.f32 %v741_v55, %v656_v26  ;;  %v658_v54 = vadd.f32 %v650_v51, %v500_v45 }
 0x133   :  { %v784_v38 = vadd.f32 %v681_v56, %v653_v27  ;;  %v785_v39 = vadd.f32 %v701_v57, %v654_v28  ;;  %v1453_v28 = vperm.slane %v3902_v31, 4 }
 0x135   :  { %vm3952_vm14 = vcmp.eq.s32.totalorder %v1453_v28, 1 }
 0x139   :  { %v853_v58 = vpop.f32.mrf.mxu2  ;;  %v873_v59 = vpop.f32.mrf.mxu3 }
 0x13a   :  { %v761_v60 = vpop.f32.mrf.mxu0  ;;  %v781_v61 = vpop.f32.mrf.mxu1  ;;  %v956_v46 = vadd.f32 %v853_v58, %v784_v38  ;;  %v957_v47 = vadd.f32 %v873_v59, %v785_v39 }
 0x13b   :  { %v788_v10 = vadd.f32 %v761_v60, %v657_v53  ;;  %v789_v56 = vadd.f32 %v781_v61, %v658_v54 }
 0x141   :  { %v3886_v62 = vpop.f32.mrf.mxu2  ;;  %v3888_v63 = vpop.f32.mrf.mxu3 }
 0x142   :  { %v893_v3 = vpop.f32.mrf.mxu0  ;;  %v913_v5 = vpop.f32.mrf.mxu1  ;;  %v961_v60 = vadd.f32 %v3888_v63, %v789_v56 }
 0x143   :  { %v958_v42 = vadd.f32 %v893_v3, %v786_v32  ;;  %v959_v43 = vadd.f32 %v913_v5, %v787_v33  ;;  %v1454_v32 = vperm.slane %v3902_v31, 5 }
 0x145   :  { %vm3956_vm15 = vcmp.eq.s32.totalorder %v1454_v32, 1 }
 0x149   :  { %v1051_v6 = vpop.f32.mrf.mxu2  ;;  %v1071_v7 = vpop.f32.mrf.mxu3 }
 0x14a   :  { %v1011_v9 = vpop.f32.mrf.mxu0  ;;  %v1031_v11 = vpop.f32.mrf.mxu1  ;;  %v1116_v35 = vadd.f32 %v1051_v6, %v958_v42  ;;  %v1117_v52 = vadd.f32 %v1071_v7, %v959_v43 }
 0x14b   :  { %v1114_v55 = vadd.f32 %v1011_v9, %v956_v46  ;;  %v1115_v16 = vadd.f32 %v1031_v11, %v957_v47  ;;  %v960_v11 = vadd.f32 %v3886_v62, %v788_v10 }
 0x151   :  { %v1169_v12 = vpop.f32.mrf.mxu2  ;;  %v1189_v13 = vpop.f32.mrf.mxu3 }
 0x152   :  { %v3890_v14 = vpop.f32.mrf.mxu0  ;;  %v3892_v15 = vpop.f32.mrf.mxu1  ;;  %v1272_v57 = vadd.f32 %v1169_v12, %v1114_v55  ;;  %v1273_v58 = vadd.f32 %v1189_v13, %v1115_v16 }
 0x153   :  { %v1118_v22 = vadd.f32 %v3890_v14, %v960_v11  ;;  %v1119_v62 = vadd.f32 %v3892_v15, %v961_v60 }
 0x159   :  { %v3897_v29 = vpop.f32.mrf.mxu2  ;;  %v3899_v30 = vpop.f32.mrf.mxu3 }
 0x15a   :  { %v1209_v4 = vpop.f32.mrf.mxu0  ;;  %v1229_v36 = vpop.f32.mrf.mxu1  ;;  %v1276_v33 = vadd.f32 %v3897_v29, %v1118_v22 }
 0x15b   :  { %v1274_v40 = vadd.f32 %v1209_v4, %v1116_v35  ;;  %v1275_v8 = vadd.f32 %v1229_v36, %v1117_v52  ;;  %v1277_v4 = vadd.f32 %v3899_v30, %v1119_v62 }
 0x161   :  { %v1367_v59 = vpop.f32.mrf.mxu2  ;;  %v1387_v3 = vpop.f32.mrf.mxu3 }
 0x162   :  { %v1432_v51 = vadd.f32 %v1367_v59, %v1274_v40  ;;  %v1433_v6 = vadd.f32 %v1387_v3, %v1275_v8  ;;  %v1327_v7 = vpop.f32.mrf.mxu0  ;;  %v1347_v9 = vpop.f32.mrf.mxu1 }
 0x163   :  { %v1430_v61 = vadd.f32 %v1327_v7, %v1272_v57  ;;  %v1431_v12 = vadd.f32 %v1347_v9, %v1273_v58 }
 0x164   :  { %v1444_v13 = vadd.f32 %v1440_v2, %v1432_v51  ;;  %v1445_v17 = vadd.f32 %v1440_v2, %v1433_v6 }
 0x165   :  { %v1442_v20 = vadd.f32 %v1440_v2, %v1430_v61  ;;  %v1443_v21 = vadd.f32 %v1440_v2, %v1431_v12 }
 0x166   :  { %v3930_v63 = vsel %vm3908_vm10, %v1444_v13, 0.0  ;;  %v3934_v23 = vsel %vm3912_vm11, %v1445_v17, 0.0 }
 0x167   :  { %v1469_v24 = vand.u32 2147483647, %v3930_v63  ;;  %v3939_v25 = vsel %vm3918_vm12, %v1442_v20, 0.0  ;;  %v3943_v26 = vsel %vm3922_vm13, %v1443_v21, 0.0  ;;  %v1470_v14 = vand.u32 2147483647, %v3934_v23 }
 0x168   :  { %v1467_v15 = vand.u32 2147483647, %v3939_v25  ;;  %v1468_v27 = vand.u32 2147483647, %v3943_v26  ;;  %vm1491_vm9 = vcmp.ge.f32.partialorder %v3939_v25, 0.0  ;;  %vm1492_vm8 = vcmp.ge.f32.partialorder %v3943_v26, 0.0 }
 0x169   :  { %v1475_v36 = vsub.f32 0.0, %v1469_v24  ;;  %v1476_v0 = vsub.f32 0.0, %v1470_v14  ;;  %vm1493_vm7 = vcmp.ge.f32.partialorder %v3930_v63, 0.0  ;;  %vm1494_vm6 = vcmp.ge.f32.partialorder %v3934_v23, 0.0 }
 0x16a   :  { %v1473_v37 = vsub.f32 0.0, %v1467_v15  ;;  %v1474_v38 = vsub.f32 0.0, %v1468_v27  ;;  %v1407_v39 = vpop.f32.mrf.mxu0  ;;  %v1427_v42 = vpop.f32.mrf.mxu1 }
 0x16b   :  { %v1483_v43 = vmul.f32 1.442695, %v1475_v36  ;;  %v1434_v44 = vadd.f32 %v1407_v39, %v1276_v33  ;;  %v1435_v45 = vadd.f32 %v1427_v42, %v1277_v4  ;;  %v1485_v49 = vmul.f32 1.442695, %v1476_v0 }
 0x16c   :  { %v1479_v46 = vmul.f32 1.442695, %v1473_v37  ;;  %v1481_v47 = vmul.f32 1.442695, %v1474_v38 }
 0x16d   :  { %3547 = vpow2.f32 %v1483_v43  ;;  %v1446_v29 = vadd.f32 %v1440_v2, %v1434_v44  ;;  %v1447_v30 = vadd.f32 %v1440_v2, %v1435_v45 }
 0x16e   :  { %3549 = vpow2.f32 %v1479_v46 }
 0x16f   :  { %3551 = vpow2.f32 %v1481_v47  ;;  %v1465_v35 = vsel %vm3952_vm14, %v1446_v29, 0.0  ;;  %v3964_v52 = vsel %vm3956_vm15, %v1447_v30, 0.0 }
 0x170   :  { %v1471_v53 = vand.u32 2147483647, %v1465_v35  ;;  %v1472_v54 = vand.u32 2147483647, %v3964_v52  ;;  %3553 = vpow2.f32 %v1485_v49 }
 0x172   :  { %v1477_v55 = vsub.f32 0.0, %v1471_v53  ;;  %v1478_v16 = vsub.f32 0.0, %v1472_v54 }
 0x173   :  { %v3548_v40 = vpop.eup %3547 }
 0x174   :  { %v3550_v8 = vpop.eup %3549  ;;  %v1487_v41 = vmul.f32 1.442695, %v1477_v55  ;;  %v1489_v10 = vmul.f32 1.442695, %v1478_v16  ;;  %v1505_v57 = vadd.f32 1.0, %v3548_v40  ;;  %v1499_v21 = vsel %vm1493_vm7, 1.0, %v3548_v40 }
 0x175   :  { %v3552_v2 = vpop.eup %3551  ;;  %v1503_v1 = vadd.f32 1.0, %v3550_v8  ;;  %v1497_v6 = vsel %vm1491_vm9, 1.0, %v3550_v8  ;;  %vm1495_vm7 = vcmp.ge.f32.partialorder %v1465_v35, 0.0  ;;  %v3608_v16 = vmov 1  }
 0x176   :  { %v1504_v56 = vadd.f32 1.0, %v3552_v2  ;;  %3555 = vpow2.f32 %v1487_v41  ;;  %v3554_v58 = vpop.eup %3553  ;;  %v1498_v60 = vsel %vm1492_vm8, 1.0, %v3552_v2  ;;  %3422 = vset.pattern.permute.xlu2 %v3608_v16 }
 0x177   :  { %3557 = vrcp.f32 %v1503_v1  ;;  %v1506_v59 = vadd.f32 1.0, %v3554_v58  ;;  %v1500_v24 = vsel %vm1494_vm6, 1.0, %v3554_v58  ;;  %vm1496_vm6 = vcmp.ge.f32.partialorder %v3964_v52, 0.0 }
 0x178   :  { %3559 = vrcp.f32 %v1504_v56 }
 0x179   :  { %3561 = vpow2.f32 %v1489_v10 }
 0x17a   :  { %3563 = vrcp.f32 %v1505_v57 }
 0x17b   :  { %3565 = vrcp.f32 %v1506_v59 }
 0x17c   :  { %v3556_v3 = vpop.eup %3555 }
 0x17d   :  { %v3558_v51 = vpop.eup %3557  ;;  %v1507_v7 = vadd.f32 1.0, %v3556_v3  ;;  %v1501_v4 = vsel %vm1495_vm7, 1.0, %v3556_v3 }
 0x17e   :  { %v3560_v9 = vpop.eup %3559  ;;  %v1515_v11 = vmul.f32 %v3558_v51, %v1497_v6 }
 0x17f   :  { %v3562_v61 = vpop.eup %3561  ;;  %v1516_v12 = vmul.f32 %v3560_v9, %v1498_v60  ;;  %3567 = vrcp.f32 %v1507_v7  ;;  %v3609_v9 = vmov 2  }
 0x180   :  { %v3564_v13 = vpop.eup %3563  ;;  %v3971_v17 = vmul.f32 %v1515_v11, %v3939_v25  ;;  %v1508_v20 = vadd.f32 1.0, %v3562_v61  ;;  %v1502_v43 = vsel %vm1496_vm6, 1.0, %v3562_v61 }
 0x181   :  { %v3566_v22 = vpop.eup %3565  ;;  %v3975_v62 = vmul.f32 %v1516_v12, %v3943_v26  ;;  %v1517_v14 = vmul.f32 %v3564_v13, %v1499_v21 }
 0x182   :  { %v1527_v15 = vmul.f32 %v3971_v17, %v3971_v17  ;;  %3569 = vrcp.f32 %v1508_v20  ;;  %v1518_v27 = vmul.f32 %v3566_v22, %v1500_v24 }
 0x183   :  { %v1528_v28 = vmul.f32 %v3975_v62, %v3975_v62  ;;  %v3982_v25 = vmul.f32 %v1517_v14, %v3930_v63  ;;  %v1533_v32 = vadd.f32 %v3975_v62, %v3971_v17 }
 0x184   :  { %v1524_v26 = vmul.f32 %v1518_v27, %v3934_v23 }
 0x185   :  { %v3568_v33 = vpop.eup %3567  ;;  %v1534_v36 = vadd.f32 %v1533_v32, %v3982_v25  ;;  %v1529_v0 = vmul.f32 %v3982_v25, %v3982_v25  ;;  %v1540_v37 = vadd.f32 %v1528_v28, %v1527_v15 }
 0x186   :  { %v1519_v38 = vmul.f32 %v3568_v33, %v1501_v4  ;;  %v1530_v45 = vmul.f32 %v1524_v26, %v1524_v26 }
 0x187   :  { %v1541_v39 = vadd.f32 %v1540_v37, %v1529_v0  ;;  %v1535_v44 = vadd.f32 %v1534_v36, %v1524_v26  ;;  %v3610_v37 = vmov 0.0  }
 0x188   :  { %v3570_v63 = vpop.eup %3569  ;;  %v1525_v42 = vmul.f32 %v1519_v38, %v1465_v35 }
 0x189   :  { %v1520_v46 = vmul.f32 %v3570_v63, %v1502_v43  ;;  %v1542_v29 = vadd.f32 %v1541_v39, %v1530_v45 }
 0x18a   :  { %v1536_v47 = vadd.f32 %v1535_v44, %v1525_v42  ;;  %v1531_v23 = vmul.f32 %v1525_v42, %v1525_v42 }
 0x18b   :  { %v1526_v30 = vmul.f32 %v1520_v46, %v3964_v52 }
 0x18c   :  { %v1543_v49 = vadd.f32 %v1542_v29, %v1531_v23 }
 0x18d   :  { %v1537_v53 = vadd.f32 %v1536_v47, %v1526_v30  ;;  %v1532_v54 = vmul.f32 %v1526_v30, %v1526_v30 }
 0x18f   :  { %1538 = vadd.xlane.f32.xlu0 %v1537_v53  ;;  %v1544_v55 = vadd.f32 %v1543_v49, %v1532_v54 }
 0x191   :  { %1545 = vadd.xlane.f32.xlu1 %v1544_v55 }
 0x202   :  { %v1539_v40 = vpop.xlane.xlu0 %1538 }
 0x203   :  { %v1547_v35 = vmul.f32 0.001953125, %v1539_v40  ;;  %v3221_v40 = vld [vmem:[%s4295_s4 + $0x8] sm:$0xff] }
 0x204   :  { %v1546_v8 = vpop.xlane.xlu1 %1545 }
 0x205   :  { %v1549_v41 = vmul.f32 %v1547_v35, %v1547_v35  ;;  %v1548_v2 = vmul.f32 0.001953125, %v1546_v8  ;;  %v1564_v60 = vsub.f32 %v3971_v17, %v1547_v35  ;;  %v1565_v61 = vsub.f32 %v3975_v62, %v1547_v35 }
 0x206   :  { %v1566_v12 = vsub.f32 %v3982_v25, %v1547_v35  ;;  %v1567_v13 = vsub.f32 %v1524_v26, %v1547_v35  ;;  %v1569_v20 = vsub.f32 %v1526_v30, %v1547_v35  ;;  %v1568_v14 = vsub.f32 %v1525_v42, %v1547_v35 }
 0x207   :  { %v1550_v1 = vsub.f32 %v1548_v2, %v1549_v41 }
 0x209   :  { %v1551_v10 = vmax.f32 %v1550_v1, 0.0 }
 0x20b   :  { %v1552_v56 = vadd.f32 1e-05, %v1551_v10 }
 0x20d   :  { %3571 = vrsqrt.f32 %v1552_v56  ;;  %vm1559_vm9 = vweird.f32 %v1552_v56 }
 0x213   :  { %v3572_v57 = vpop.eup %3571 }
 0x214   :  { %v1554_v52 = vmul.f32 %v3572_v57, %v1552_v56  ;;  %vm1560_vm8 = vweird.f32 %v3572_v57 }
 0x215   :  { %vm1561_vm7 = vmor %vm1559_vm9, %vm1560_vm8 }
 0x216   :  { %v1555_v58 = vmul.f32 %v3572_v57, %v1554_v52 }
 0x218   :  { %v1556_v59 = vmul.f32 0.5, %v1555_v58 }
 0x21a   :  { %v1557_v3 = vsub.f32 1.5, %v1556_v59 }
 0x21c   :  { %v1558_v51 = vmul.f32 %v3572_v57, %v1557_v3 }
 0x21e   :  { %v1562_v6 = vsel %vm1561_vm7, %v3572_v57, %v1558_v51 }
 0x21f   :  { %v1563_v7 = vmul.f32 %v1562_v6, %v3877_v34 }
 0x221   :  { %1572 = vperm.xlu2 %3422, %v1563_v7  }
 0x229   :  { %3423 = vset.pattern.permute.xlu2 %v3609_v9 }
 0x22a   :  { %1582 = vperm.xlu2 %3423, %v3877_v34  }
 0x27b   :  { %v1573_v11 = vpop.permute.xlu2 %1572 }
 0x27c   :  { %v1575_v21 = vmul.f32 %v1573_v11, %v1564_v60  ;;  %v1576_v22 = vmul.f32 %v1573_v11, %v1565_v61  ;;  %v1577_v24 = vmul.f32 %v1573_v11, %v1566_v12  ;;  %v1578_v15 = vmul.f32 %v1573_v11, %v1567_v13 }
 0x27d   :  { %v1580_v28 = vmul.f32 %v1573_v11, %v1569_v20  ;;  %v1579_v17 = vmul.f32 %v1573_v11, %v1568_v14 }
 0x284   :  { %v1583_v27 = vpop.permute.xlu2 %1582 }
 0x285   :  { %v3999_v32 = vadd.f32 %v1583_v27, %v1575_v21  ;;  %v4001_v33 = vadd.f32 %v1583_v27, %v1576_v22  ;;  %v4003_v34 = vadd.f32 %v1583_v27, %v1577_v24  ;;  %v4005_v4 = vadd.f32 %v1583_v27, %v1578_v15  ;;  %v1605_v22 = vld [vmem:[%s4295_s4] sm:$0xff] }
 0x286   :  { %v4007_v62 = vadd.f32 %v1583_v27, %v1580_v28  ;;  %v4018_v39 = vadd.f32 %v1583_v27, %v1579_v17 }
 0x287   :  { %v1591_v25 = vsel %vm3918_vm12, %v3999_v32, 0.0  ;;  %v1592_v26 = vsel %vm3922_vm13, %v4001_v33, 0.0  ;;  %v1593_v36 = vsel %vm3908_vm10, %v4003_v34, 0.0  ;;  %v1594_v63 = vsel %vm3912_vm11, %v4005_v4, 0.0 }
 0x288   :  { %v3439_v0 = vpack.i.bf16 %v1593_v36, %v1592_v26  ;;  %v3444_v38 = vpack.i.bf16 %v1591_v25, %v3610_v37  ;;  %v1596_v42 = vsel %vm3956_vm15, %v4007_v62, 0.0  ;;  %v1595_v43 = vsel %vm3952_vm14, %v4018_v39, 0.0 }
 0x289   :  { %v3514_v44 = vpack.i.bf16 %v1594_v63, %v1593_v36  ;;  %v3529_v45 = vpack.i.bf16 %v1592_v26, %v1591_v25  ;;  %v3539_v46 = vpack.i.bf16 %v1594_v63, %v1596_v42  ;;  %v3459_v47 = vpack.i.bf16 %v1594_v63, %v1592_v26 }
 0x28a   :  { %3440 = vrot.lane.b32.xlu0 %v3439_v0, %s3600_s30  ;;  %3445 = vrot.lane.b32.xlu1 %v3444_v38, %s3600_s30  ;;  %v3464_v23 = vpack.i.bf16 %v1593_v36, %v1595_v43  ;;  %v3479_v29 = vpack.i.bf16 %v1595_v43, %v1594_v63  ;;  %v3504_v30 = vpack.i.bf16 %v1595_v43, %v1593_v36 }
 0x28b   :  { %3425 = vrot.lane.b32.xlu2 %v3444_v38, %s3599_s29  ;;  %v3524_v49 = vpack.i.bf16 %v1596_v42, %v1595_v43 }
 0x292   :  { %3460 = vrot.lane.b32.xlu0 %v3459_v47, %s3601_s13  ;;  %3465 = vrot.lane.b32.xlu1 %v3464_v23, %s3601_s13 }
 0x293   :  { %3430 = vrot.lane.b32.xlu2 %v3459_v47, %s3599_s29 }
 0x29a   :  { %1934 = vrot.lane.b32.xlu0 %v1596_v42, %s3601_s13  ;;  %3475 = vrot.lane.b32.xlu1 %v3444_v38, %s3602_s14 }
 0x29b   :  { %3435 = vrot.lane.b32.xlu2 %v3464_v23, %s3599_s29 }
 0x2a2   :  { %3480 = vrot.lane.b32.xlu0 %v3479_v29, %s3602_s14  ;;  %3485 = vrot.lane.b32.xlu1 %v3514_v44, %s3603_s15 }
 0x2a3   :  { %1634 = vrot.lane.b32.xlu2 %v1596_v42, %s3599_s29 }
 0x2aa   :  { %3490 = vrot.lane.b32.xlu0 %v3529_v45, %s3603_s15  ;;  %3500 = vrot.lane.b32.xlu1 %v3529_v45, %s3604_s18 }
 0x2ab   :  { %3450 = vrot.lane.b32.xlu2 %v3479_v29, %s3600_s30  ;;  %v3234_v29 = vld [vmem:[%s4295_s4 + $0x10] sm:$0xff] }
 0x2b2   :  { %3505 = vrot.lane.b32.xlu0 %v3504_v30, %s3604_s18  ;;  %3510 = vrot.lane.b32.xlu1 %v3539_v46, %s3604_s18 }
 0x2b3   :  { %3455 = vrot.lane.b32.xlu2 %v3444_v38, %s3601_s13 }
 0x2ba   :  { %2550 = vrot.lane.b32.xlu0 %v3610_v37, %s3604_s18  ;;  %3520 = vrot.lane.b32.xlu1 %v3529_v45, %s3605_s19 }
 0x2bb   :  { %1783 = vrot.lane.b32.xlu2 %v1596_v42, %s3600_s30 }
 0x2c2   :  { %3525 = vrot.lane.b32.xlu0 %v3524_v49, %s3605_s19  ;;  %3535 = vrot.lane.b32.xlu1 %v3504_v30, %s3606_s0 }
 0x2c3   :  { %3470 = vrot.lane.b32.xlu2 %v3439_v0, %s3602_s14 }
 0x2ca   :  { %2707 = vrot.lane.b32.xlu0 %v3610_v37, %s3605_s19  ;;  %2864 = vrot.lane.b32.xlu1 %v3610_v37, %s3606_s0 }
 0x2cb   :  { %2091 = vrot.lane.b32.xlu2 %v1596_v42, %s3602_s14 }
 0x2d3   :  { %3495 = vrot.lane.b32.xlu2 %v3524_v49, %s3603_s15 }
 0x2db   :  { %2393 = vrot.lane.b32.xlu2 %v3610_v37, %s3603_s15 }
 0x2e3   :  { %3515 = vrot.lane.b32.xlu2 %v3514_v44, %s3605_s19 }
 0x2e5   :  { %v3426_v53 = vpop.permute.xlu2 %3425 }
 0x2e6   :  { %v3428_v54 = vunpack.i.h.bf16 %v3426_v53  ;;  %v3427_v55 = vunpack.i.l.bf16 %v3426_v53 }
 0x2e8   :  { %v1636_v35 = vsel %vm56_vm0, %v3427_v55, %v3428_v54 }
 0x2e9   :  { %1666 = vmatpush.msrb.mxu2 %v1636_v35 }
 0x2ea   :  { %3222 = vmatmul.msk.f32.vlgmr.msrb.gmra.mxu2 %vm69_vm1, %v3221_v40 }
 0x2eb   :  { %3530 = vrot.lane.b32.xlu2 %v3529_v45, %s3606_s0 }
 0x2ed   :  { %v3431_v8 = vpop.permute.xlu2 %3430 }
 0x2ee   :  { %v3432_v41 = vunpack.i.l.bf16 %v3431_v8  ;;  %v3433_v10 = vunpack.i.h.bf16 %v3431_v8 }
 0x2f0   :  { %v1637_v2 = vsel %vm56_vm0, %v3428_v54, %v3432_v41 }
 0x2f1   :  { %1686 = vmatpush.msrb.mxu3 %v1637_v2 }
 0x2f2   :  { %3223 = vmatmul.msk.f32.vlgmr.msrb.gmra.mxu3 %vm69_vm1, %v3221_v40 }
 0x2f3   :  { %3540 = vrot.lane.b32.xlu2 %v3539_v46, %s3606_s0 }
 0x2f5   :  { %v3436_v1 = vpop.permute.xlu2 %3435 }
 0x2f6   :  { %v3438_v56 = vunpack.i.h.bf16 %v3436_v1  ;;  %v3437_v57 = vunpack.i.l.bf16 %v3436_v1 }
 0x2f8   :  { %v1638_v52 = vsel %vm56_vm0, %v3432_v41, %v3438_v56  ;;  %v1639_v58 = vsel %vm56_vm0, %v3438_v56, %v3433_v10  ;;  %v1640_v59 = vsel %vm56_vm0, %v3433_v10, %v3437_v57  ;;  %v3241_v56 = vld [vmem:[%s4295_s4 + $0x18] sm:$0xff] }
 0x2f9   :  { %1706 = vmatpush.msra.mxu0 %v1638_v52  ;;  %1726 = vmatpush.msra.mxu1 %v1639_v58 }
 0x2fa   :  { %1746 = vmatpush.msra.mxu2 %v1640_v59  ;;  %3224 = vmatmul.msk.f32.vlgmr.msra.gmra.mxu0 %vm69_vm1, %v3221_v40 }
 0x2fb   :  { %3226 = vmatmul.msk.f32.vlgmr.msra.gmra.mxu2 %vm69_vm1, %v3221_v40  ;;  %3225 = vmatmul.msk.f32.vlgmr.msra.gmra.mxu1 %vm69_vm1, %v3221_v40 }
 0x2fc   :  { %v3441_v3 = vpop.permute.xlu0 %3440  ;;  %v3446_v51 = vpop.permute.xlu1 %3445 }
 0x2fd   :  { %v3443_v6 = vunpack.i.h.bf16 %v3441_v3  ;;  %v3442_v7 = vunpack.i.l.bf16 %v3441_v3  ;;  %v3448_v11 = vunpack.i.h.bf16 %v3446_v51  ;;  %v3447_v60 = vunpack.i.l.bf16 %v3446_v51  ;;  %v1635_v61 = vpop.permute.xlu2 %1634 }
 0x2fe   :  { %v1641_v12 = vsel %vm56_vm0, %v3437_v57, %v1635_v61  ;;  %vm4313_vm0 = vcmask 908288  }
 0x2ff   :  { %1766 = vmatpush.msra.mxu3 %v1641_v12  ;;  %v1785_v13 = vsel %vm207_vm2, %v3447_v60, %v3448_v11  ;;  %v1786_v20 = vsel %vm207_vm2, %v3448_v11, %v3442_v7  ;;  %v1787_v21 = vsel %vm207_vm2, %v3442_v7, %v3443_v6  ;;  %vm4317_vm6 = vmmov %vm4313_vm0 }
 0x300   :  { %1815 = vmatpush.msrb.mxu0 %v1785_v13  ;;  %1835 = vmatpush.msrb.mxu1 %v1786_v20  ;;  %vm4319_vm8 = vmmov %vm4313_vm0 }
 0x301   :  { %1855 = vmatpush.msrb.mxu2 %v1787_v21  ;;  %3227 = vmatmul.msk.f32.vlgmr.msra.gmra.mxu3 %vm69_vm1, %v3221_v40 }
 0x302   :  { %3228 = vmatmul.msk.f32.vlgmr.msrb.gmra.mxu0 %vm69_vm1, %v1605_v22 }
 0x303   :  { %3230 = vmatmul.msk.f32.vlgmr.msrb.gmra.mxu2 %vm69_vm1, %v1605_v22  ;;  %3229 = vmatmul.msk.f32.vlgmr.msrb.gmra.mxu1 %vm69_vm1, %v1605_v22 }
 0x304   :  { %v3461_v24 = vpop.permute.xlu0 %3460  ;;  %v3466_v14 = vpop.permute.xlu1 %3465 }
 0x305   :  { %v3462_v15 = vunpack.i.l.bf16 %v3461_v24  ;;  %v3468_v27 = vunpack.i.h.bf16 %v3466_v14  ;;  %v3451_v28 = vpop.permute.xlu2 %3450  ;;  %v3463_v44 = vunpack.i.h.bf16 %v3461_v24  ;;  %v3467_v45 = vunpack.i.l.bf16 %v3466_v14 }
 0x306   :  { %v3453_v17 = vunpack.i.h.bf16 %v3451_v28  ;;  %v3452_v25 = vunpack.i.l.bf16 %v3451_v28 }
 0x307   :  { %v1938_v0 = vsel %vm359_vm3, %v3462_v15, %v3468_v27  ;;  %v1940_v53 = vsel %vm359_vm3, %v3463_v44, %v3467_v45  ;;  %v1939_v10 = vsel %vm359_vm3, %v3468_v27, %v3463_v44 }
 0x308   :  { %v1788_v26 = vsel %vm207_vm2, %v3443_v6, %v3452_v25  ;;  %v1789_v36 = vsel %vm207_vm2, %v3452_v25, %v3453_v17 }
 0x309   :  { %1875 = vmatpush.msrb.mxu3 %v1788_v26  ;;  %1895 = vmatpush.msra.mxu0 %v1789_v36  ;;  %v3255_v26 = vld [vmem:[%s4295_s4 + $0x28] sm:$0xff] }
 0x30a   :  { %3231 = vmatmul.msk.f32.vlgmr.msrb.gmra.mxu3 %vm69_vm1, %v1605_v22  ;;  %3232 = vmatmul.msk.f32.vlgmr.msra.gmra.mxu0 %vm69_vm1, %v1605_v22 }
 0x30b   :  { %2006 = vmatpush.msrb.mxu0 %v1938_v0 }
 0x30c   :  { %v1935_v37 = vpop.permute.xlu0 %1934  ;;  %v3476_v38 = vpop.permute.xlu1 %3475 }
 0x30d   :  { %v3478_v63 = vunpack.i.h.bf16 %v3476_v38  ;;  %v3477_v42 = vunpack.i.l.bf16 %v3476_v38  ;;  %v3456_v43 = vpop.permute.xlu2 %3455  ;;  %v1941_v54 = vsel %vm359_vm3, %v3467_v45, %v1935_v37 }
 0x30e   :  { %v3458_v46 = vunpack.i.h.bf16 %v3456_v43  ;;  %v3457_v47 = vunpack.i.l.bf16 %v3456_v43 }
 0x30f   :  { %v2093_v23 = vsel %vm517_vm4, %v3477_v42, %v3478_v63 }
 0x310   :  { %v1936_v30 = vsel %vm359_vm3, %v3457_v47, %v3458_v46  ;;  %v1937_v49 = vsel %vm359_vm3, %v3458_v46, %v3462_v15  ;;  %2123 = vmatpush.msra.mxu0 %v2093_v23  ;;  %vm4315_vm3 = vmmov %vm4313_vm0 }
 0x311   :  { %1966 = vmatpush.msra.mxu2 %v1936_v30  ;;  %1986 = vmatpush.msra.mxu3 %v1937_v49 }
 0x312   :  { %3235 = vmatmul.msk.f32.vlgmr.msra.gmra.mxu2 %vm69_vm1, %v3234_v29  ;;  %3236 = vmatmul.msk.f32.vlgmr.msra.gmra.mxu3 %vm69_vm1, %v3234_v29 }
 0x313   :  { %3237 = vmatmul.msk.f32.vlgmr.msrb.gmra.mxu0 %vm69_vm1, %v3234_v29  ;;  %2046 = vmatpush.msrb.mxu2 %v1940_v53 }
 0x314   :  { %2066 = vmatpush.msrb.mxu3 %v1941_v54  ;;  %v3481_v55 = vpop.permute.xlu0 %3480  ;;  %v3486_v2 = vpop.permute.xlu1 %3485 }
 0x315   :  { %v3483_v40 = vunpack.i.h.bf16 %v3481_v55  ;;  %v3482_v35 = vunpack.i.l.bf16 %v3481_v55  ;;  %v1784_v8 = vpop.permute.xlu2 %1783  ;;  %v3488_v13 = vunpack.i.h.bf16 %v3486_v2  ;;  %v3487_v20 = vunpack.i.l.bf16 %v3486_v2 }
 0x316   :  { %v1790_v41 = vsel %vm207_vm2, %v3453_v17, %v1784_v8  ;;  %vm4314_vm2 = vmmov %vm4313_vm0 }
 0x317   :  { %1915 = vmatpush.msra.mxu1 %v1790_v41  ;;  %v2097_v1 = vsel %vm517_vm4, %v3482_v35, %v3483_v40 }
 0x318   :  { %3233 = vmatmul.msk.f32.vlgmr.msra.gmra.mxu1 %vm69_vm1, %v1605_v22  ;;  %2203 = vmatpush.msrb.mxu0 %v2097_v1 }
 0x319   :  { %2026 = vmatpush.msrb.mxu1 %v1939_v10  ;;  %v4180_v10 = vld [vmem:[%s4296_s5] sm:$0xff] }
 0x31a   :  { %3239 = vmatmul.msk.f32.vlgmr.msrb.gmra.mxu2 %vm69_vm1, %v3234_v29  ;;  %3240 = vmatmul.msk.f32.vlgmr.msrb.gmra.mxu3 %vm69_vm1, %v3234_v29 }
 0x31b   :  { %3242 = vmatmul.msk.f32.vlgmr.msra.gmra.mxu0 %vm69_vm1, %v3241_v56  ;;  %3010 = vperm.xlu0 %3544, %v4180_v10  }
 0x31c   :  { %3285 = vmatpush.msk.msra.mxu0 %vm3908_vm10, %v4003_v34  ;;  %v3491_v57 = vpop.permute.xlu0 %3490  ;;  %v3501_v60 = vpop.permute.xlu1 %3500 }
 0x31d   :  { %v3471_v52 = vpop.permute.xlu2 %3470  ;;  %v3493_v58 = vunpack.i.h.bf16 %v3491_v57  ;;  %v3492_v59 = vunpack.i.l.bf16 %v3491_v57  ;;  %v3503_v14 = vunpack.i.h.bf16 %v3501_v60  ;;  %v3502_v15 = vunpack.i.l.bf16 %v3501_v60 }
 0x31e   :  { %v3473_v3 = vunpack.i.h.bf16 %v3471_v52  ;;  %v3472_v51 = vunpack.i.l.bf16 %v3471_v52 }
 0x31f   :  { %v2395_v34 = vsel %vm820_vm5, %v3492_v59, %v3493_v58  ;;  %v2552_v0 = vsel %vm4313_vm0, %v3502_v15, %v3503_v14 }
 0x320   :  { %3238 = vmatmul.msk.f32.vlgmr.msrb.gmra.mxu1 %vm69_vm1, %v3234_v29  ;;  %v2094_v6 = vsel %vm517_vm4, %v3478_v63, %v3472_v51  ;;  %v2095_v7 = vsel %vm517_vm4, %v3472_v51, %v3473_v3  ;;  %v2096_v11 = vsel %vm517_vm4, %v3473_v3, %v3482_v35  ;;  %v3262_v35 = vld [vmem:[%s4295_s4 + $0x30] sm:$0xff] }
 0x321   :  { %2143 = vmatpush.msra.mxu1 %v2094_v6  ;;  %2163 = vmatpush.msra.mxu2 %v2095_v7  ;;  %v3269_v6 = vld [vmem:[%s4295_s4 + $0x38] sm:$0xff] }
 0x322   :  { %2183 = vmatpush.msra.mxu3 %v2096_v11  ;;  %3244 = vmatmul.msk.f32.vlgmr.msra.gmra.mxu2 %vm69_vm1, %v3241_v56 }
 0x323   :  { %3245 = vmatmul.msk.f32.vlgmr.msra.gmra.mxu3 %vm69_vm1, %v3241_v56  ;;  %3246 = vmatmul.msk.f32.vlgmr.msrb.gmra.mxu0 %vm69_vm1, %v3241_v56 }
 0x324   :  { %3283 = vmatpush.msk.msrb.mxu2 %vm3918_vm12, %v3999_v32  ;;  %3284 = vmatpush.msk.msrb.mxu3 %vm3922_vm13, %v4001_v33  ;;  %v3248_v32 = vld [vmem:[%s4295_s4 + $0x20] sm:$0xff]  ;;  %v3506_v33 = vpop.permute.xlu0 %3505 }
 0x325   :  { %2425 = vmatpush.msrb.mxu0 %v2395_v34  ;;  %v2092_v61 = vpop.permute.xlu2 %2091  ;;  %v3507_v27 = vunpack.i.l.bf16 %v3506_v33  ;;  %v3508_v44 = vunpack.i.h.bf16 %v3506_v33  ;;  %3545 = vset.pattern.permute.xlu0 %v3608_v16  ;;  %v3276_v16 = vld [vmem:[%s4295_s4 + $0x40] sm:$0xff] }
 0x326   :  { %3287 = vmatpush.msk.msra.mxu2 %vm3952_vm14, %v4018_v39  ;;  %3288 = vmatpush.msk.msra.mxu3 %vm3956_vm15, %v4007_v62  ;;  %v2098_v12 = vsel %vm517_vm4, %v3483_v40, %v2092_v61  ;;  %v3511_v39 = vpop.permute.xlu1 %3510  ;;  %v2397_v62 = vsel %vm820_vm5, %v3487_v20, %v3488_v13  ;;  %vm4316_vm4 = vmmov %vm4313_vm0 }
 0x327   :  { %2223 = vmatpush.msrb.mxu1 %v2098_v12  ;;  %v3513_v28 = vunpack.i.h.bf16 %v3511_v39  ;;  %v2553_v37 = vsel %vm4314_vm2, %v3503_v14, %v3507_v27  ;;  %v3512_v45 = vunpack.i.l.bf16 %v3511_v39 }
 0x328   :  { %3243 = vmatmul.msk.f32.vlgmr.msra.gmra.mxu1 %vm69_vm1, %v3241_v56 }
 0x329   :  { %3286 = vmatpush.msk.msra.mxu1 %vm3912_vm11, %v4005_v4  ;;  %v2396_v4 = vsel %vm820_vm5, %v3493_v58, %v3487_v20  ;;  %v2554_v38 = vsel %vm4315_vm3, %v3507_v27, %v3513_v28  ;;  %v2556_v29 = vsel %vm4317_vm6, %v3508_v44, %v3512_v45  ;;  %v2555_v41 = vsel %vm4319_vm8, %v3513_v28, %v3508_v44 }
 0x32a   :  { %3249 = vmatmul.msk.f32.vlgmr.msrb.gmra.mxu2 %vm69_vm1, %v3248_v32  ;;  %vm4324_vm3 = vcmask 891904  }
 0x32b   :  { %3250 = vmatmul.msk.f32.vlgmr.msrb.gmra.mxu3 %vm69_vm1, %v3248_v32  ;;  %3251 = vmatmul.msk.f32.vlgmr.msra.gmra.mxu0 %vm69_vm1, %v3248_v32  ;;  %vm4328_vm8 = vmmov %vm4324_vm3 }
 0x32c   :  { %2465 = vmatpush.msrb.mxu2 %v2397_v62  ;;  %v2551_v36 = vpop.permute.xlu0 %2550 }
 0x32d   :  { %v3496_v21 = vpop.permute.xlu2 %3495  ;;  %v2557_v23 = vsel %vm4316_vm4, %v3512_v45, %v2551_v36  ;;  %vm4325_vm4 = vmmov %vm4324_vm3 }
 0x32e   :  { %v3498_v22 = vunpack.i.h.bf16 %v3496_v21  ;;  %v3497_v24 = vunpack.i.l.bf16 %v3496_v21  ;;  %v3521_v63 = vpop.permute.xlu1 %3520 }
 0x32f   :  { %v3523_v46 = vunpack.i.h.bf16 %v3521_v63  ;;  %v3522_v47 = vunpack.i.l.bf16 %v3521_v63 }
 0x330   :  { %3247 = vmatmul.msk.f32.vlgmr.msrb.gmra.mxu1 %vm69_vm1, %v3241_v56  ;;  %v2398_v17 = vsel %vm820_vm5, %v3488_v13, %v3497_v24  ;;  %v2399_v25 = vsel %vm820_vm5, %v3497_v24, %v3498_v22 }
 0x331   :  { %2445 = vmatpush.msrb.mxu1 %v2396_v4  ;;  %2485 = vmatpush.msrb.mxu3 %v2398_v17 }
 0x332   :  { %2505 = vmatpush.msra.mxu0 %v2399_v25  ;;  %3253 = vmatmul.msk.f32.vlgmr.msra.gmra.mxu2 %vm69_vm1, %v3248_v32 }
 0x333   :  { %3254 = vmatmul.msk.f32.vlgmr.msra.gmra.mxu3 %vm69_vm1, %v3248_v32  ;;  %3256 = vmatmul.msk.f32.vlgmr.msrb.gmra.mxu0 %vm69_vm1, %v3255_v26 }
 0x334   :  { %2582 = vmatpush.msra.mxu2 %v2552_v0  ;;  %2602 = vmatpush.msra.mxu3 %v2553_v37  ;;  %v3526_v30 = vpop.permute.xlu0 %3525 }
 0x335   :  { %2622 = vmatpush.msrb.mxu0 %v2554_v38  ;;  %v2394_v42 = vpop.permute.xlu2 %2393  ;;  %v3527_v40 = vunpack.i.l.bf16 %v3526_v30  ;;  %v3528_v8 = vunpack.i.h.bf16 %v3526_v30 }
 0x336   :  { %v2400_v43 = vsel %vm820_vm5, %v3498_v22, %v2394_v42  ;;  %vm4318_vm5 = vcmask 900096   ;;  %v3536_v56 = vpop.permute.xlu1 %3535 }
 0x337   :  { %v2709_v49 = vsel %vm4318_vm5, %v3522_v47, %v3523_v46  ;;  %vm4320_vm9 = vmmov %vm4318_vm5  ;;  %v3537_v3 = vunpack.i.l.bf16 %v3536_v56  ;;  %v3538_v20 = vunpack.i.h.bf16 %v3536_v56 }
 0x338   :  { %3252 = vmatmul.msk.f32.vlgmr.msra.gmra.mxu1 %vm69_vm1, %v3248_v32  ;;  %vm4321_vm7 = vmmov %vm4318_vm5 }
 0x339   :  { %2525 = vmatpush.msra.mxu1 %v2400_v43  ;;  %vm4322_vm0 = vmmov %vm4318_vm5 }
 0x33a   :  { %3258 = vmatmul.msk.f32.vlgmr.msrb.gmra.mxu2 %vm69_vm1, %v3255_v26  ;;  %v2713_v57 = vsel %vm4322_vm0, %v3527_v40, %v3528_v8  ;;  %vm4323_vm2 = vmmov %vm4322_vm0 }
 0x33b   :  { %3259 = vmatmul.msk.f32.vlgmr.msrb.gmra.mxu3 %vm69_vm1, %v3255_v26  ;;  %3260 = vmatmul.msk.f32.vlgmr.msra.gmra.mxu0 %vm69_vm1, %v3255_v26  ;;  %vm4326_vm6 = vmmov %vm4322_vm0 }
 0x33c   :  { %2662 = vmatpush.msrb.mxu2 %v2556_v29  ;;  %2682 = vmatpush.msrb.mxu3 %v2557_v23  ;;  %v2708_v60 = vpop.permute.xlu0 %2707  ;;  %vm4327_vm5 = vmmov %vm4324_vm3 }
 0x33d   :  { %2739 = vmatpush.msra.mxu0 %v2709_v49  ;;  %v3516_v53 = vpop.permute.xlu2 %3515  ;;  %v2714_v32 = vsel %vm4326_vm6, %v3528_v8, %v2708_v60 }
 0x33e   :  { %v3518_v54 = vunpack.i.h.bf16 %v3516_v53  ;;  %v3517_v55 = vunpack.i.l.bf16 %v3516_v53  ;;  %v2865_v13 = vpop.permute.xlu1 %2864 }
 0x340   :  { %3257 = vmatmul.msk.f32.vlgmr.msrb.gmra.mxu1 %vm69_vm1, %v3255_v26  ;;  %v2711_v2 = vsel %vm4320_vm9, %v3517_v55, %v3518_v54  ;;  %v2712_v1 = vsel %vm4321_vm7, %v3518_v54, %v3527_v40  ;;  %v2710_v51 = vsel %vm4323_vm2, %v3523_v46, %v3517_v55  ;;  %vm4329_vm9 = vmmov %vm4324_vm3 }
 0x341   :  { %2642 = vmatpush.msrb.mxu1 %v2555_v41  ;;  %vm4330_vm7 = vmmov %vm4324_vm3 }
 0x342   :  { %3263 = vmatmul.msk.f32.vlgmr.msra.gmra.mxu2 %vm69_vm1, %v3262_v35 }
 0x343   :  { %3264 = vmatmul.msk.f32.vlgmr.msra.gmra.mxu3 %vm69_vm1, %v3262_v35  ;;  %3265 = vmatmul.msk.f32.vlgmr.msrb.gmra.mxu0 %vm69_vm1, %v3262_v35 }
 0x344   :  { %2779 = vmatpush.msra.mxu2 %v2711_v2  ;;  %2799 = vmatpush.msra.mxu3 %v2712_v1 }
 0x345   :  { %2819 = vmatpush.msrb.mxu0 %v2713_v57  ;;  %v3531_v52 = vpop.permute.xlu2 %3530 }
 0x346   :  { %v3533_v58 = vunpack.i.h.bf16 %v3531_v52  ;;  %v3532_v59 = vunpack.i.l.bf16 %v3531_v52 }
 0x348   :  { %3261 = vmatmul.msk.f32.vlgmr.msra.gmra.mxu1 %vm69_vm1, %v3255_v26  ;;  %v2866_v7 = vsel %vm4324_vm3, %v3532_v59, %v3533_v58  ;;  %v2867_v11 = vsel %vm4325_vm4, %v3533_v58, %v3537_v3 }
 0x349   :  { %2759 = vmatpush.msra.mxu1 %v2710_v51 }
 0x34a   :  { %3267 = vmatmul.msk.f32.vlgmr.msrb.gmra.mxu2 %vm69_vm1, %v3262_v35 }
 0x34b   :  { %3268 = vmatmul.msk.f32.vlgmr.msrb.gmra.mxu3 %vm69_vm1, %v3262_v35  ;;  %3270 = vmatmul.msk.f32.vlgmr.msra.gmra.mxu0 %vm69_vm1, %v3269_v6 }
 0x34c   :  { %2896 = vmatpush.msrb.mxu2 %v2866_v7  ;;  %2916 = vmatpush.msrb.mxu3 %v2867_v11 }
 0x34d   :  { %v3541_v34 = vpop.permute.xlu2 %3540 }
 0x34e   :  { %v3543_v61 = vunpack.i.h.bf16 %v3541_v34  ;;  %v3542_v12 = vunpack.i.l.bf16 %v3541_v34 }
 0x350   :  { %3266 = vmatmul.msk.f32.vlgmr.msrb.gmra.mxu1 %vm69_vm1, %v3262_v35  ;;  %v2868_v33 = vsel %vm4327_vm5, %v3537_v3, %v3543_v61  ;;  %v2871_v39 = vsel %vm4328_vm8, %v3542_v12, %v2865_v13  ;;  %v2870_v62 = vsel %vm4329_vm9, %v3538_v20, %v3542_v12  ;;  %v2869_v21 = vsel %vm4330_vm7, %v3543_v61, %v3538_v20 }
 0x351   :  { %2839 = vmatpush.msrb.mxu1 %v2714_v32  ;;  %2936 = vmatpush.msra.mxu0 %v2868_v33 }
 0x352   :  { %3272 = vmatmul.msk.f32.vlgmr.msra.gmra.mxu2 %vm69_vm1, %v3269_v6 }
 0x353   :  { %3273 = vmatmul.msk.f32.vlgmr.msra.gmra.mxu3 %vm69_vm1, %v3269_v6  ;;  %3274 = vmatmul.msk.f32.vlgmr.msrb.gmra.mxu0 %vm69_vm1, %v3269_v6 }
 0x354   :  { %2976 = vmatpush.msra.mxu2 %v2870_v62  ;;  %2996 = vmatpush.msra.mxu3 %v2871_v39 }
 0x358   :  { %3271 = vmatmul.msk.f32.vlgmr.msra.gmra.mxu1 %vm69_vm1, %v3269_v6 }
 0x359   :  { %2956 = vmatpush.msra.mxu1 %v2869_v21 }
 0x35a   :  { %3277 = vmatmul.msk.f32.vlgmr.msrb.gmra.mxu2 %vm69_vm1, %v3276_v16 }
 0x35b   :  { %3278 = vmatmul.msk.f32.vlgmr.msrb.gmra.mxu3 %vm69_vm1, %v3276_v16  ;;  %3279 = vmatmul.msk.f32.vlgmr.msra.gmra.mxu0 %vm69_vm1, %v3276_v16 }
 0x360   :  { %3275 = vmatmul.msk.f32.vlgmr.msrb.gmra.mxu1 %vm69_vm1, %v3269_v6 }
 0x362   :  { %3281 = vmatmul.msk.f32.vlgmr.msra.gmra.mxu2 %vm69_vm1, %v3276_v16 }
 0x363   :  { %3282 = vmatmul.msk.f32.vlgmr.msra.gmra.mxu3 %vm69_vm1, %v3276_v16 }
 0x368   :  { %3280 = vmatmul.msk.f32.vlgmr.msra.gmra.mxu1 %vm69_vm1, %v3276_v16 }
 0x36d   :  { %v1668_v22 = vpop.f32.mrf.mxu2 }
 0x375   :  { %v1688_v15 = vpop.f32.mrf.mxu3 }
 0x377   :  { %v1708_v24 = vpop.f32.mrf.mxu0 }
 0x378   :  { %v1728_v14 = vpop.f32.mrf.mxu1 }
 0x37e   :  { %v1748_v27 = vpop.f32.mrf.mxu2 }
 0x37f   :  { %v1817_v28 = vpop.f32.mrf.mxu0 }
 0x380   :  { %v1818_v4 = vadd.f32 %v1817_v28, %v1668_v22  ;;  %v1837_v17 = vpop.f32.mrf.mxu1 }
 0x381   :  { %v1838_v25 = vadd.f32 %v1837_v17, %v1688_v15 }
 0x384   :  { %v1768_v26 = vpop.f32.mrf.mxu3 }
 0x386   :  { %v1857_v36 = vpop.f32.mrf.mxu2 }
 0x387   :  { %v1897_v0 = vpop.f32.mrf.mxu0  ;;  %v1858_v37 = vadd.f32 %v1857_v36, %v1708_v24 }
 0x388   :  { %v1898_v38 = vadd.f32 %v1897_v0, %v1748_v27 }
 0x38d   :  { %v1877_v63 = vpop.f32.mrf.mxu3 }
 0x38e   :  { %v1878_v42 = vadd.f32 %v1877_v63, %v1728_v14 }
 0x390   :  { %v2008_v43 = vpop.f32.mrf.mxu0 }
 0x391   :  { %v2073_v34 = vadd.f32 %v2008_v43, %v1858_v37 }
 0x395   :  { %v1917_v44 = vpop.f32.mrf.mxu1  ;;  %v1968_v45 = vpop.f32.mrf.mxu2 }
 0x396   :  { %v1918_v46 = vadd.f32 %v1917_v44, %v1768_v26  ;;  %v1988_v47 = vpop.f32.mrf.mxu3  ;;  %v2071_v13 = vadd.f32 %v1968_v45, %v1818_v4  ;;  %v3011_v44 = vpop.permute.xlu0 %3010 }
 0x397   :  { %v2072_v24 = vadd.f32 %v1988_v47, %v1838_v25 }
 0x398   :  { %v2125_v23 = vpop.f32.mrf.mxu0 }
 0x399   :  { %v2228_v62 = vadd.f32 %v2125_v23, %v2071_v13 }
 0x39d   :  { %v2028_v29 = vpop.f32.mrf.mxu1  ;;  %v2048_v30 = vpop.f32.mrf.mxu2 }
 0x39e   :  { %v2068_v49 = vpop.f32.mrf.mxu3  ;;  %v2075_v14 = vadd.f32 %v2048_v30, %v1898_v38  ;;  %v2074_v23 = vadd.f32 %v2028_v29, %v1878_v42 }
 0x3a0   :  { %v2205_v53 = vpop.f32.mrf.mxu0 }
 0x3a1   :  { %v2232_v63 = vadd.f32 %v2205_v53, %v2075_v14 }
 0x3a5   :  { %v2145_v54 = vpop.f32.mrf.mxu1  ;;  %v2165_v55 = vpop.f32.mrf.mxu2 }
 0x3a6   :  { %v2185_v40 = vpop.f32.mrf.mxu3  ;;  %v2230_v12 = vadd.f32 %v2165_v55, %v2073_v34  ;;  %v2229_v27 = vadd.f32 %v2145_v54, %v2072_v24 }
 0x3a7   :  { %v2231_v38 = vadd.f32 %v2185_v40, %v2074_v23 }
 0x3a8   :  { %v2296_v35 = vpop.f32.mrf.mxu0 }
 0x3a9   :  { %v2361_v33 = vadd.f32 %v2296_v35, %v2230_v12 }
 0x3ad   :  { %v2225_v8 = vpop.f32.mrf.mxu1  ;;  %v2256_v41 = vpop.f32.mrf.mxu2 }
 0x3ae   :  { %v2276_v2 = vpop.f32.mrf.mxu3  ;;  %v2359_v22 = vadd.f32 %v2256_v41, %v2228_v62 }
 0x3af   :  { %v2360_v37 = vadd.f32 %v2276_v2, %v2229_v27 }
 0x3b0   :  { %v2427_v1 = vpop.f32.mrf.mxu0 }
 0x3b1   :  { %v2530_v26 = vadd.f32 %v2427_v1, %v2359_v22 }
 0x3b5   :  { %v2316_v56 = vpop.f32.mrf.mxu1  ;;  %v2336_v57 = vpop.f32.mrf.mxu2 }
 0x3b6   :  { %v2356_v52 = vpop.f32.mrf.mxu3  ;;  %v2363_v35 = vadd.f32 %v2336_v57, %v2232_v63 }
 0x3b8   :  { %v2507_v58 = vpop.f32.mrf.mxu0 }
 0x3bd   :  { %v2447_v59 = vpop.f32.mrf.mxu1  ;;  %v2467_v3 = vpop.f32.mrf.mxu2 }
 0x3be   :  { %v2487_v51 = vpop.f32.mrf.mxu3  ;;  %v2532_v16 = vadd.f32 %v2467_v3, %v2361_v33  ;;  %v2531_v45 = vadd.f32 %v2447_v59, %v2360_v37  ;;  %v2076_v3 = vadd.f32 %v2068_v49, %v1918_v46 }
 0x3c0   :  { %v2624_v6 = vpop.f32.mrf.mxu0  ;;  %v2233_v30 = vadd.f32 %v2225_v8, %v2076_v3 }
 0x3c1   :  { %v2689_v15 = vadd.f32 %v2624_v6, %v2532_v16  ;;  %v2362_v6 = vadd.f32 %v2316_v56, %v2231_v38 }
 0x3c2   :  { %v2364_v29 = vadd.f32 %v2356_v52, %v2233_v30 }
 0x3c3   :  { %v2533_v49 = vadd.f32 %v2487_v51, %v2362_v6 }
 0x3c5   :  { %v2527_v7 = vpop.f32.mrf.mxu1  ;;  %v2584_v11 = vpop.f32.mrf.mxu2 }
 0x3c6   :  { %v2604_v60 = vpop.f32.mrf.mxu3  ;;  %v2687_v4 = vadd.f32 %v2584_v11, %v2530_v26  ;;  %v2534_v11 = vadd.f32 %v2507_v58, %v2363_v35  ;;  %v2535_v8 = vadd.f32 %v2527_v7, %v2364_v29 }
 0x3c7   :  { %v2688_v41 = vadd.f32 %v2604_v60, %v2531_v45 }
 0x3c8   :  { %v2741_v61 = vpop.f32.mrf.mxu0 }
 0x3c9   :  { %v2844_v47 = vadd.f32 %v2741_v61, %v2687_v4 }
 0x3cd   :  { %v2644_v20 = vpop.f32.mrf.mxu1  ;;  %v2664_v32 = vpop.f32.mrf.mxu2 }
 0x3ce   :  { %v2684_v39 = vpop.f32.mrf.mxu3  ;;  %v2691_v57 = vadd.f32 %v2664_v32, %v2534_v11  ;;  %v2690_v12 = vadd.f32 %v2644_v20, %v2533_v49 }
 0x3cf   :  { %v2692_v56 = vadd.f32 %v2684_v39, %v2535_v8 }
 0x3d0   :  { %v2821_v21 = vpop.f32.mrf.mxu0 }
 0x3d1   :  { %v2848_v52 = vadd.f32 %v2821_v21, %v2691_v57 }
 0x3d5   :  { %v2761_v28 = vpop.f32.mrf.mxu1  ;;  %v2781_v17 = vpop.f32.mrf.mxu2 }
 0x3d6   :  { %v2846_v36 = vadd.f32 %v2781_v17, %v2689_v15  ;;  %v2801_v0 = vpop.f32.mrf.mxu3  ;;  %v2845_v54 = vadd.f32 %v2761_v28, %v2688_v41 }
 0x3d7   :  { %v2847_v51 = vadd.f32 %v2801_v0, %v2690_v12 }
 0x3d8   :  { %v2938_v43 = vpop.f32.mrf.mxu0 }
 0x3d9   :  { %v3003_v55 = vadd.f32 %v2938_v43, %v2846_v36 }
 0x3db   :  { %v3015_v25 = vadd.f32 %v3011_v44, %v3003_v55 }
 0x3dd   :  { %v4217_v1 = vsel %vm3908_vm10, %v3015_v25, 0.0  ;;  %v2841_v2 = vpop.f32.mrf.mxu1  ;;  %v2898_v53 = vpop.f32.mrf.mxu2 }
 0x3de   :  { %v3027_v59 = vand.u32 2147483647, %v4217_v1  ;;  %v3001_v34 = vadd.f32 %v2898_v53, %v2844_v47  ;;  %v2918_v42 = vpop.f32.mrf.mxu3  ;;  %v2849_v7 = vadd.f32 %v2841_v2, %v2692_v56 }
 0x3df   :  { %v3002_v46 = vadd.f32 %v2918_v42, %v2845_v54 }
 0x3e0   :  { %v3033_v40 = vsub.f32 0.0, %v3027_v59  ;;  %v3013_v60 = vadd.f32 %v3011_v44, %v3001_v34 }
 0x3e1   :  { %v3014_v61 = vadd.f32 %v3011_v44, %v3002_v46 }
 0x3e2   :  { %v3041_v5 = vmul.f32 1.442695, %v3033_v40  ;;  %v4222_v13 = vsel %vm3918_vm12, %v3013_v60, 0.0 }
 0x3e3   :  { %v3025_v58 = vand.u32 2147483647, %v4222_v13  ;;  %v4227_v33 = vsel %vm3922_vm13, %v3014_v61, 0.0  ;;  %vm3049_vm1 = vcmp.ge.f32.partialorder %v4222_v13, 0.0 }
 0x3e4   :  { %3573 = vpow2.f32 %v3041_v5  ;;  %v3026_v32 = vand.u32 2147483647, %v4227_v33  ;;  %vm3050_vm10 = vcmp.ge.f32.partialorder %v4227_v33, 0.0 }
 0x3e5   :  { %v3031_v62 = vsub.f32 0.0, %v3025_v58  ;;  %v2958_v20 = vpop.f32.mrf.mxu1  ;;  %v2978_v16 = vpop.f32.mrf.mxu2 }
 0x3e6   :  { %v3032_v22 = vsub.f32 0.0, %v3026_v32  ;;  %v3004_v18 = vadd.f32 %v2958_v20, %v2847_v51  ;;  %v3005_v24 = vadd.f32 %v2978_v16, %v2848_v52  ;;  %v2998_v14 = vpop.f32.mrf.mxu3 }
 0x3e7   :  { %v3037_v39 = vmul.f32 1.442695, %v3031_v62  ;;  %v3006_v15 = vadd.f32 %v2998_v14, %v2849_v7 }
 0x3e8   :  { %v3039_v27 = vmul.f32 1.442695, %v3032_v22  ;;  %v3016_v28 = vadd.f32 %v3011_v44, %v3004_v18  ;;  %v3017_v19 = vadd.f32 %v3011_v44, %v3005_v24 }
 0x3e9   :  { %3575 = vpow2.f32 %v3037_v39  ;;  %v3018_v17 = vadd.f32 %v3011_v44, %v3006_v15 }
 0x3ea   :  { %v3574_v21 = vpop.eup %3573  ;;  %3577 = vpow2.f32 %v3039_v27  ;;  %v3022_v26 = vsel %vm3912_vm11, %v3016_v28, 0.0  ;;  %v4234_v36 = vsel %vm3952_vm14, %v3017_v19, 0.0  ;;  %vm3051_vm11 = vcmp.ge.f32.partialorder %v4217_v1, 0.0 }
 0x3eb   :  { %v3028_v0 = vand.u32 2147483647, %v3022_v26  ;;  %v3029_v37 = vand.u32 2147483647, %v4234_v36  ;;  %v4239_v63 = vsel %vm3956_vm15, %v3018_v17, 0.0  ;;  %v3063_v4 = vadd.f32 1.0, %v3574_v21 }
 0x3ec   :  { %v3030_v44 = vand.u32 2147483647, %v4239_v63  ;;  %v3057_v34 = vsel %vm3051_vm11, 1.0, %v3574_v21  ;;  %vm3052_vm12 = vcmp.ge.f32.partialorder %v3022_v26, 0.0  ;;  %vm3053_vm13 = vcmp.ge.f32.partialorder %v4234_v36, 0.0 }
 0x3ed   :  { %v3034_v43 = vsub.f32 0.0, %v3028_v0  ;;  %v3035_v45 = vsub.f32 0.0, %v3029_v37  ;;  %3579 = vrcp.f32 %v3063_v4  ;;  %vm3054_vm14 = vcmp.ge.f32.partialorder %v4239_v63, 0.0 }
 0x3ee   :  { %v3036_v50 = vsub.f32 0.0, %v3030_v44 }
 0x3ef   :  { %v3576_v55 = vpop.eup %3575  ;;  %v3043_v23 = vmul.f32 1.442695, %v3034_v43  ;;  %v3045_v48 = vmul.f32 1.442695, %v3035_v45 }
 0x3f0   :  { %v3578_v35 = vpop.eup %3577  ;;  %v3061_v3 = vadd.f32 1.0, %v3576_v55  ;;  %v3047_v25 = vmul.f32 1.442695, %v3036_v50  ;;  %v3055_v30 = vsel %vm3049_vm1, 1.0, %v3576_v55 }
 0x3f1   :  { %v3062_v41 = vadd.f32 1.0, %v3578_v35  ;;  %3581 = vpow2.f32 %v3043_v23  ;;  %v3056_v6 = vsel %vm3050_vm10, 1.0, %v3578_v35 }
 0x3f2   :  { %3583 = vrcp.f32 %v3061_v3 }
 0x3f3   :  { %3585 = vrcp.f32 %v3062_v41  ;;  %v3580_v31 = vpop.eup %3579 }
 0x3f4   :  { %3587 = vpow2.f32 %v3045_v48  ;;  %v3075_v49 = vmul.f32 %v3580_v31, %v3057_v34 }
 0x3f5   :  { %3589 = vpow2.f32 %v3047_v25 }
 0x3f6   :  { %v4256_v61 = vmul.f32 %v3075_v49, %v4217_v1 }
 0x3f7   :  { %v3582_v38 = vpop.eup %3581 }
 0x3f8   :  { %v3584_v47 = vpop.eup %3583  ;;  %v3064_v54 = vadd.f32 1.0, %v3582_v38  ;;  %v3087_v1 = vmul.f32 %v4256_v61, %v4256_v61 }
 0x3f9   :  { %v3586_v2 = vpop.eup %3585  ;;  %v3073_v53 = vmul.f32 %v3584_v47, %v3055_v30 }
 0x3fa   :  { %v3588_v11 = vpop.eup %3587  ;;  %v3074_v59 = vmul.f32 %v3586_v2, %v3056_v6  ;;  %3591 = vrcp.f32 %v3064_v54 }
 0x3fb   :  { %v3590_v42 = vpop.eup %3589  ;;  %v4246_v29 = vmul.f32 %v3073_v53, %v4222_v13  ;;  %v3065_v46 = vadd.f32 1.0, %v3588_v11  ;;  %v3058_v13 = vsel %vm3052_vm12, 1.0, %v3582_v38  ;;  %v3059_v51 = vsel %vm3053_vm13, 1.0, %v3588_v11 }
 0x3fc   :  { %v4249_v57 = vmul.f32 %v3074_v59, %v4227_v33  ;;  %v3066_v40 = vadd.f32 1.0, %v3590_v42  ;;  %v3060_v20 = vsel %vm3054_vm14, 1.0, %v3590_v42 }
 0x3fd   :  { %v3085_v60 = vmul.f32 %v4246_v29, %v4246_v29  ;;  %3593 = vrcp.f32 %v3065_v46 }
 0x3fe   :  { %v3086_v8 = vmul.f32 %v4249_v57, %v4249_v57  ;;  %3595 = vrcp.f32 %v3066_v40  ;;  %v3091_v12 = vadd.f32 %v4249_v57, %v4246_v29 }
 0x400   :  { %v3592_v5 = vpop.eup %3591  ;;  %v3098_v58 = vadd.f32 %v3086_v8, %v3085_v60  ;;  %v3092_v32 = vadd.f32 %v3091_v12, %v4256_v61 }
 0x401   :  { %v3076_v56 = vmul.f32 %v3592_v5, %v3058_v13 }
 0x402   :  { %v3099_v24 = vadd.f32 %v3098_v58, %v3087_v1 }
 0x403   :  { %v3594_v33 = vpop.eup %3593  ;;  %v3082_v52 = vmul.f32 %v3076_v56, %v3022_v26 }
 0x404   :  { %v3596_v7 = vpop.eup %3595  ;;  %v3077_v62 = vmul.f32 %v3594_v33, %v3059_v51 }
 0x405   :  { %v3078_v16 = vmul.f32 %v3596_v7, %v3060_v20  ;;  %v3093_v22 = vadd.f32 %v3092_v32, %v3082_v52  ;;  %v3088_v18 = vmul.f32 %v3082_v52, %v3082_v52 }
 0x406   :  { %v3083_v14 = vmul.f32 %v3077_v62, %v4234_v36 }
 0x407   :  { %v3084_v39 = vmul.f32 %v3078_v16, %v4239_v63  ;;  %v3100_v15 = vadd.f32 %v3099_v24, %v3088_v18 }
 0x408   :  { %v3094_v27 = vadd.f32 %v3093_v22, %v3083_v14  ;;  %v3089_v28 = vmul.f32 %v3083_v14, %v3083_v14 }
 0x409   :  { %v3090_v17 = vmul.f32 %v3084_v39, %v3084_v39 }
 0x40a   :  { %v3095_v19 = vadd.f32 %v3094_v27, %v3084_v39  ;;  %v3101_v21 = vadd.f32 %v3100_v15, %v3089_v28 }
 0x40c   :  { %3096 = vadd.xlane.f32.xlu2 %v3095_v19  ;;  %v3102_v26 = vadd.f32 %v3101_v21, %v3090_v17 }
 0x40e   :  { %3103 = vadd.xlane.f32.xlu1 %v3102_v26 }
 0x47f   :  { %v3097_v0 = vpop.xlane.xlu2 %3096 }
 0x480   :  { %v3105_v37 = vmul.f32 0.001953125, %v3097_v0 }
 0x481   :  { %v3104_v4 = vpop.xlane.xlu1 %3103 }
 0x482   :  { %v3107_v43 = vmul.f32 %v3105_v37, %v3105_v37  ;;  %v3106_v45 = vmul.f32 0.001953125, %v3104_v4  ;;  %v3122_v38 = vsub.f32 %v4246_v29, %v3105_v37  ;;  %v3123_v47 = vsub.f32 %v4249_v57, %v3105_v37 }
 0x483   :  { %v3124_v30 = vsub.f32 %v4256_v61, %v3105_v37  ;;  %v3125_v54 = vsub.f32 %v3082_v52, %v3105_v37  ;;  %v3126_v2 = vsub.f32 %v3083_v14, %v3105_v37  ;;  %v3127_v59 = vsub.f32 %v3084_v39, %v3105_v37 }
 0x484   :  { %v3108_v44 = vsub.f32 %v3106_v45, %v3107_v43 }
 0x486   :  { %v3109_v55 = vmax.f32 %v3108_v44, 0.0 }
 0x488   :  { %v3110_v23 = vadd.f32 1e-05, %v3109_v55 }
 0x48a   :  { %3597 = vrsqrt.f32 %v3110_v23  ;;  %vm3117_vm0 = vweird.f32 %v3110_v23 }
 0x490   :  { %v3598_v36 = vpop.eup %3597 }
 0x491   :  { %v3112_v63 = vmul.f32 %v3598_v36, %v3110_v23  ;;  %vm3118_vm15 = vweird.f32 %v3598_v36 }
 0x492   :  { %vm3119_vm2 = vmor %vm3117_vm0, %vm3118_vm15 }
 0x493   :  { %v3113_v50 = vmul.f32 %v3598_v36, %v3112_v63 }
 0x495   :  { %v3114_v35 = vmul.f32 0.5, %v3113_v50 }
 0x497   :  { %v3115_v3 = vsub.f32 1.5, %v3114_v35 }
 0x499   :  { %v3116_v48 = vmul.f32 %v3598_v36, %v3115_v3 }
 0x49b   :  { %v3120_v41 = vsel %vm3119_vm2, %v3598_v36, %v3116_v48 }
 0x49c   :  { %v3121_v25 = vmul.f32 %v3120_v41, %v4180_v10 }
 0x49e   :  { %3130 = vperm.xlu0 %3545, %v3121_v25  }
 0x4a6   :  { %3546 = vset.pattern.permute.xlu0 %v3609_v9 }
 0x4a7   :  { %3140 = vperm.xlu0 %3546, %v4180_v10  }
 0x510   :  { %v3131_v31 = vpop.permute.xlu0 %3130 }
 0x511   :  { %v3133_v53 = vmul.f32 %v3131_v31, %v3122_v38  ;;  %v3134_v6 = vmul.f32 %v3131_v31, %v3123_v47  ;;  %v3135_v11 = vmul.f32 %v3131_v31, %v3124_v30  ;;  %v3136_v34 = vmul.f32 %v3131_v31, %v3125_v54 }
 0x512   :  { %v3137_v46 = vmul.f32 %v3131_v31, %v3126_v2  ;;  %v3138_v10 = vmul.f32 %v3131_v31, %v3127_v59 }
 0x519   :  { %v3141_v42 = vpop.permute.xlu0 %3140 }
 0x51a   :  { %v3143_v49 = vadd.f32 %v3141_v42, %v3133_v53  ;;  %v3144_v9 = vadd.f32 %v3141_v42, %v3134_v6  ;;  %v3145_v40 = vadd.f32 %v3141_v42, %v3135_v11  ;;  %v3146_v60 = vadd.f32 %v3141_v42, %v3136_v34 }
 0x51b   :  { %v3147_v8 = vadd.f32 %v3141_v42, %v3137_v46  ;;  %v3148_v29 = vadd.f32 %v3141_v42, %v3138_v10 }
 0x51c   :  { %3149 = vst [vmem:[%s4297_s6] sm:$0xff] %v3143_v49 }
 0x51d   :  { %3150 = vst [vmem:[%s4297_s6 + $0x8] sm:$0xff] %v3144_v9 }
 0x51e   :  { %3151 = vst [vmem:[%s4297_s6 + $0x10] sm:$0xff] %v3145_v40 }
 0x51f   :  { %3152 = vst [vmem:[%s4297_s6 + $0x18] sm:$0xff] %v3146_v60 }
 0x520   :  { %3153 = vst [vmem:[%s4297_s6 + $0x20] sm:$0xff] %v3147_v8 }
 0x521   :  { %3154 = vst [vmem:[%s4297_s6 + $0x28] sm:$0xff] %v3148_v29 }

</bundles_post_ra>
